<compile_context>
chip_gen: v5e
topology: v5e:2x2
jax: 0.10.0
libtpu: 0.0.40
codegen_flags: <defaults>
</compile_context>

<pallas_src>
import functools
import math

import jax
import jax.numpy as jnp
from jax import lax
from jax.experimental import pallas as pl
from jax.experimental.pallas import tpu as pltpu


def _flash_attn_kernel(q_ref, k_ref, v_ref, o_ref, m_ref, l_ref, acc_ref, qs_ref,
                       *, scale2):
    """One (head-block, q-tile, kv-tile) grid step.

    q_ref: [hb, ch, tq], k_ref/v_ref: [hb, ch, tk], o_ref: [hb, ch, tq]
    scratch: m/l [hb, 1, tq] f32 (running max / denom), acc [hb, ch, tq] f32,
             qs [hb, ch, tq] input dtype (q pre-scaled once per q-tile).
    """
    ki = pl.program_id(2)

    @pl.when(ki == 0)
    def _():
        m_ref[...] = jnp.full_like(m_ref, -jnp.inf)
        l_ref[...] = jnp.zeros_like(l_ref)
        acc_ref[...] = jnp.zeros_like(acc_ref)
        # Hoisted q pre-scale: once per q-tile, reused across every kv step.
        # scale2 == (1/sqrt(sqrt(ch)))**2 folds torch's symmetric q/k scaling.
        qs_ref[...] = (q_ref[...] * scale2).astype(qs_ref.dtype)

    q = qs_ref[...]                                  # [hb, ch, tq]  pre-scaled
    k = k_ref[...]                                   # [hb, ch, tk]
    v = v_ref[...]                                   # [hb, ch, tk]

    # s[h, kpos, qpos] = sum_c k[h,c,kpos] * q[h,c,qpos]  -- lane axis stays tq.
    s = lax.dot_general(k, q, (((1,), (1,)), ((0,), (0,))),
                        preferred_element_type=jnp.float32)      # [hb, tk, tq]
    # NOTE: a *scalar* qk_bias added to every logit is softmax-shift-invariant,
    # so the add is intentionally omitted (pure dead work).
    # TODO(synk): boolean mask / per-position bias path not wired in; this kernel
    # implements the mask=None case only (mask would apply before the max update).

    m_prev = m_ref[...]                              # [hb, 1, tq]
    m_cur = jnp.maximum(m_prev, jnp.max(s, axis=1, keepdims=True))
    corr = jnp.exp(m_prev - m_cur)                   # [hb, 1, tq]
    p = jnp.exp(s - m_cur)                           # [hb, tk, tq] f32
    l_ref[...] = corr * l_ref[...] + jnp.sum(p, axis=1, keepdims=True)
    m_ref[...] = m_cur

    # acc[h, c, qpos] += sum_k v[h,c,kpos] * p[h,kpos,qpos]  -- MXU N = tq.
    pv = lax.dot_general(v, p.astype(v.dtype), (((2,), (1,)), ((0,), (0,))),
                         preferred_element_type=jnp.float32)     # [hb, ch, tq]
    acc_ref[...] = corr * acc_ref[...] + pv

    @pl.when(ki == pl.num_programs(2) - 1)
    def _():
        l = l_ref[...]
        inv_l = pl.reciprocal(l, approx=True)        # EUP slot, ~free
        inv_l = inv_l * (2.0 - l * inv_l)            # one Newton step -> f32-grade
        o_ref[...] = (acc_ref[...] * inv_l).astype(o_ref.dtype)   # lane-dense store


def _vmem_budget_bytes():
    """Generation-aware (budget, vmem_limit, two_tensorcores) from TPU info."""
    cap = None
    try:
        cap = getattr(pltpu.get_tpu_info(), "vmem_capacity_bytes", None)
    except Exception:
        cap = None
    if cap is not None and cap >= 100 * 1024 * 1024:
        # v5e / v6e: 128 MiB VMEM, single TensorCore, lowest HBM BW -> go big.
        return 100 * 1024 * 1024, 110 * 1024 * 1024, False
    # v7x (64 MiB / TC) or unknown: stay conservative, assume 2 TCs.
    return 40 * 1024 * 1024, 48 * 1024 * 1024, True


def _vmem_estimate(hb, ch, tq, tk, itemsize):
    io = 2 * hb * ch * (2 * tq + 2 * tk) * itemsize            # dbl-buffered q/out/k/v
    scratch = hb * (ch * tq * 4                                # acc (f32)
                    + 2 * 8 * tq * 4                           # m, l (sublane-padded)
                    + ch * tq * itemsize)                      # pre-scaled q
    temps = 2 * hb * tk * tq * 4 + hb * ch * tq * 4            # s, p, pv f32 temporaries
    return io + scratch + temps


def _pick_config(n_bh, ch, length, itemsize, budget, two_tc,
                 *, block_q=None, block_k=None, block_b=None):
    """Pick (tq, tk, hb): prioritize big tq (k/v HBM re-reads), then tk, then hb."""
    def cands(forced, default):
        if forced is not None:
            return [forced]
        c = [t for t in default if t <= length and length % t == 0]
        return c if c else [length]

    tq_c = cands(block_q, (512, 256, 128))
    tk_c = cands(block_k, (512, 256, 128))
    if block_b is not None:
        hb_c = [block_b]
    else:
        hb_c = [h for h in (8, 4, 2, 1) if n_bh % h == 0] or [1]

    for tq in tq_c:
        for tk in tk_c:
            for hb in hb_c:
                # Only guard against collapsing the parallel grid on 2-TC chips.
                if two_tc and hb > 1 and (n_bh // hb) * (length // tq) < 2:
                    continue
                if _vmem_estimate(hb, ch, tq, tk, itemsize) <= budget:
                    return tq, tk, hb
    return tq_c[-1], tk_c[-1], hb_c[-1]


def qkv_attention_legacy(qkv, n_heads, qk_bias=0.0, *, block_q=None, block_k=None,
                         block_b=None):
    """JAX/Pallas equivalent of QKVAttentionLegacy.forward (mask=None path).

    qkv: [N, H * 3 * C, T]  ->  [N, H * C, T]
    qk_bias: scalar bias; softmax-shift-invariant, hence a mathematical no-op.
    """
    del qk_bias  # scalar bias cannot change softmax output
    bs, width, length = qkv.shape
    assert width % (3 * n_heads) == 0
    ch = width // (3 * n_heads)
    n_bh = bs * n_heads
    # torch scales both q and k by ch**-0.25; fold into one q-side scale.
    scale2 = 1.0 / math.sqrt(ch)

    # Metadata-only reshape; no q/k/v slice copies materialized in HBM.
    qkv_r = qkv.reshape(n_bh, 3 * ch, length)
    itemsize = jnp.dtype(qkv.dtype).itemsize

    budget, vmem_limit, two_tc = _vmem_budget_bytes()
    tq, tk, hb = _pick_config(n_bh, ch, length, itemsize, budget, two_tc,
                              block_q=block_q, block_k=block_k, block_b=block_b)
    assert length % tq == 0 and length % tk == 0
    assert (tq % 128 == 0 or tq == length) and (tk % 128 == 0 or tk == length)
    assert n_bh % hb == 0

    # Address q/k/v as channel-block 0/1/2 of the SAME [B, 3C, T] array when the
    # sublane constraint allows it; otherwise fall back to three sliced operands
    # (extra HBM copies, still correct).
    sublane = 8 * max(1, 4 // itemsize)
    if ch % sublane == 0:
        operands = (qkv_r, qkv_r, qkv_r)
        c_blocks = (0, 1, 2)
    else:
        operands = (qkv_r[:, :ch], qkv_r[:, ch:2 * ch], qkv_r[:, 2 * ch:])
        c_blocks = (0, 0, 0)

    q_spec = pl.BlockSpec((hb, ch, tq), lambda b, qi, ki, c=c_blocks[0]: (b, c, qi))
    k_spec = pl.BlockSpec((hb, ch, tk), lambda b, qi, ki, c=c_blocks[1]: (b, c, ki))
    v_spec = pl.BlockSpec((hb, ch, tk), lambda b, qi, ki, c=c_blocks[2]: (b, c, ki))
    o_spec = pl.BlockSpec((hb, ch, tq), lambda b, qi, ki: (b, 0, qi))

    kernel = functools.partial(_flash_attn_kernel, scale2=float(scale2))

    out = pl.pallas_call(
        kernel,
        out_shape=jax.ShapeDtypeStruct((n_bh, ch, length), qkv.dtype),
        grid_spec=pltpu.PrefetchScalarGridSpec(
            num_scalar_prefetch=0,
            grid=(n_bh // hb, length // tq, length // tk),   # kv (reduction) axis last
            in_specs=[q_spec, k_spec, v_spec],
            out_specs=o_spec,
            scratch_shapes=[
                pltpu.VMEM((hb, 1, tq), jnp.float32),    # running max m   (lane = tq)
                pltpu.VMEM((hb, 1, tq), jnp.float32),    # running denom l (lane = tq)
                pltpu.VMEM((hb, ch, tq), jnp.float32),   # output accumulator
                pltpu.VMEM((hb, ch, tq), qkv.dtype),     # pre-scaled q (per q-tile)
            ]),
        compiler_params=pltpu.CompilerParams(
            dimension_semantics=("parallel", "parallel", "arbitrary"),
            vmem_limit_bytes=vmem_limit),
    )(*operands)

    return out.reshape(bs, n_heads * ch, length)


def _reference(qkv, n_heads, qk_bias=0.0):
    # Pure-JAX reference mirroring the PyTorch code.
    bs, width, length = qkv.shape
    ch = width // (3 * n_heads)
    qkv_r = qkv.reshape(bs * n_heads, 3 * ch, length)
    q, k, v = qkv_r[:, :ch], qkv_r[:, ch:2 * ch], qkv_r[:, 2 * ch:]
    scale = 1.0 / math.sqrt(math.sqrt(ch))
    w = jnp.einsum('bct,bcs->bts', q * scale, k * scale) + qk_bias
    w = jax.nn.softmax(w.astype(jnp.float32), axis=-1).astype(qkv.dtype)
    a = jnp.einsum('bts,bcs->bct', w, v)
    return a.reshape(bs, -1, length)


if __name__ == "__main__":
    key = jax.random.PRNGKey(0)
    N, H, C, T = 2, 2, 16, 256          # width = H * 3 * C = 96
    qkv = jax.random.normal(key, (N, H * 3 * C, T), dtype=jnp.float32)

    # Forced small tiles so the multi-step online-softmax path (grid > 1 on q & kv) runs.
    out = qkv_attention_legacy(qkv, n_heads=H, qk_bias=0.0, block_q=128, block_k=128)
    out = jax.block_until_ready(out)
    ref = _reference(qkv, n_heads=H, qk_bias=0.0)
    assert out.shape == (N, H * C, T)
    assert jnp.allclose(out, ref, atol=2e-3, rtol=2e-3), float(jnp.max(jnp.abs(out - ref)))

    # Auto-picked (generation-aware) tiling path; non-zero scalar bias (softmax no-op).
    out_b = qkv_attention_legacy(qkv, n_heads=H, qk_bias=0.25)
    out_b = jax.block_until_ready(out_b)
    ref_b = _reference(qkv, n_heads=H, qk_bias=0.25)
    assert jnp.allclose(out_b, ref_b, atol=2e-3, rtol=2e-3)

    # bf16 fast path (bf16 MXU, half the k/v HBM bytes); f32 accumulation inside.
    qkv_h = qkv.astype(jnp.bfloat16)
    out_h = qkv_attention_legacy(qkv_h, n_heads=H, block_q=128, block_k=128)
    out_h = jax.block_until_ready(out_h)
    ref_h = _reference(qkv_h.astype(jnp.float32), n_heads=H)
    assert jnp.allclose(out_h.astype(jnp.float32), ref_h, atol=5e-2, rtol=5e-2)

    print("KERNEL_OK")
</pallas_src>

<mosaic_0001>
module attributes {stable_mosaic.version = 11 : i64} {
  func.func @_flash_attn_kernel(%arg0: i32, %arg1: i32, %arg2: i32, %arg3: memref<4x16x128xf32, #tpu.memory_space<vmem>>, %arg4: memref<4x16x128xf32, #tpu.memory_space<vmem>>, %arg5: memref<4x16x128xf32, #tpu.memory_space<vmem>>, %arg6: memref<4x16x128xf32, #tpu.memory_space<vmem>>, %arg7: memref<4x1x128xf32, #tpu.memory_space<vmem>>, %arg8: memref<4x1x128xf32, #tpu.memory_space<vmem>>, %arg9: memref<4x16x128xf32, #tpu.memory_space<vmem>>, %arg10: memref<4x16x128xf32, #tpu.memory_space<vmem>>) attributes {dimension_semantics = [#tpu.dimension_semantics<parallel>, #tpu.dimension_semantics<parallel>, #tpu.dimension_semantics<arbitrary>], iteration_bounds = array<i64: 1, 2, 2>, scalar_prefetch = 0 : i64, scratch_operands = 4 : i64, tpu.core_type = #tpu.core_type<tc>, window_params = [{transform_indices = @transform_0, window_bounds = array<i64: 4, 16, 128>}, {transform_indices = @transform_1, window_bounds = array<i64: 4, 16, 128>}, {transform_indices = @transform_2, window_bounds = array<i64: 4, 16, 128>}, {transform_indices = @transform_3, window_bounds = array<i64: 4, 16, 128>}]} {
    %c0_i32 = arith.constant 0 : i32
    %0 = arith.cmpi eq, %arg2, %c0_i32 : i32
    %1 = arith.extui %0 : i1 to i32
    %c0_i32_0 = arith.constant 0 : i32
    %2 = arith.cmpi ne, %1, %c0_i32_0 : i32
    scf.if %2 {
      %cst_31 = arith.constant 0xFF800000 : f32
      %32 = vector.broadcast %cst_31 : f32 to vector<4x1x128xf32>
      %c0_32 = arith.constant 0 : index
      %c0_33 = arith.constant 0 : index
      %c0_34 = arith.constant 0 : index
      %33 = vector.load %arg7[%c0_32, %c0_33, %c0_34] : memref<4x1x128xf32, #tpu.memory_space<vmem>>, vector<4x1x128xf32>
      tpu.vector_store %arg7[%c0_32, %c0_33, %c0_34], %32 {strides = array<i32>} : memref<4x1x128xf32, #tpu.memory_space<vmem>>, vector<4x1x128xf32>,
      %cst_35 = arith.constant 0.000000e+00 : f32
      %34 = vector.broadcast %cst_35 : f32 to vector<4x1x128xf32>
      %c0_36 = arith.constant 0 : index
      %c0_37 = arith.constant 0 : index
      %c0_38 = arith.constant 0 : index
      %35 = vector.load %arg8[%c0_36, %c0_37, %c0_38] : memref<4x1x128xf32, #tpu.memory_space<vmem>>, vector<4x1x128xf32>
      tpu.vector_store %arg8[%c0_36, %c0_37, %c0_38], %34 {strides = array<i32>} : memref<4x1x128xf32, #tpu.memory_space<vmem>>, vector<4x1x128xf32>,
      %cst_39 = arith.constant 0.000000e+00 : f32
      %36 = vector.broadcast %cst_39 : f32 to vector<4x16x128xf32>
      %c0_40 = arith.constant 0 : index
      %c0_41 = arith.constant 0 : index
      %c0_42 = arith.constant 0 : index
      %37 = vector.load %arg9[%c0_40, %c0_41, %c0_42] : memref<4x16x128xf32, #tpu.memory_space<vmem>>, vector<4x16x128xf32>
      tpu.vector_store %arg9[%c0_40, %c0_41, %c0_42], %36 {strides = array<i32>} : memref<4x16x128xf32, #tpu.memory_space<vmem>>, vector<4x16x128xf32>,
      %c0_43 = arith.constant 0 : index
      %c0_44 = arith.constant 0 : index
      %c0_45 = arith.constant 0 : index
      %38 = vector.load %arg3[%c0_43, %c0_44, %c0_45] : memref<4x16x128xf32, #tpu.memory_space<vmem>>, vector<4x16x128xf32>
      %cst_46 = arith.constant 2.500000e-01 : f32
      %39 = vector.broadcast %cst_46 : f32 to vector<4x16x128xf32>
      %40 = arith.mulf %38, %39 : vector<4x16x128xf32>
      %c0_47 = arith.constant 0 : index
      %c0_48 = arith.constant 0 : index
      %c0_49 = arith.constant 0 : index
      %41 = vector.load %arg10[%c0_47, %c0_48, %c0_49] : memref<4x16x128xf32, #tpu.memory_space<vmem>>, vector<4x16x128xf32>
      tpu.vector_store %arg10[%c0_47, %c0_48, %c0_49], %40 {strides = array<i32>} : memref<4x16x128xf32, #tpu.memory_space<vmem>>, vector<4x16x128xf32>,
    } else {
    }
    %c0 = arith.constant 0 : index
    %c0_1 = arith.constant 0 : index
    %c0_2 = arith.constant 0 : index
    %3 = vector.load %arg10[%c0, %c0_1, %c0_2] : memref<4x16x128xf32, #tpu.memory_space<vmem>>, vector<4x16x128xf32>
    %c0_3 = arith.constant 0 : index
    %c0_4 = arith.constant 0 : index
    %c0_5 = arith.constant 0 : index
    %4 = vector.load %arg4[%c0_3, %c0_4, %c0_5] : memref<4x16x128xf32, #tpu.memory_space<vmem>>, vector<4x16x128xf32>
    %c0_6 = arith.constant 0 : index
    %c0_7 = arith.constant 0 : index
    %c0_8 = arith.constant 0 : index
    %5 = vector.load %arg5[%c0_6, %c0_7, %c0_8] : memref<4x16x128xf32, #tpu.memory_space<vmem>>, vector<4x16x128xf32>
    %cst = arith.constant dense<0.000000e+00> : vector<4x128x128xf32>
    %6 = tpu.matmul %4, %3, %cst {dimension_numbers = #tpu.dot_dimension_numbers<[1], [1], [2], [2], [0, 0, 0, 2, 1, 2], [0], [0]>} : vector<4x16x128xf32>, vector<4x16x128xf32>, vector<4x128x128xf32> -> vector<4x128x128xf32>
    %c0_9 = arith.constant 0 : index
    %c0_10 = arith.constant 0 : index
    %c0_11 = arith.constant 0 : index
    %7 = vector.load %arg7[%c0_9, %c0_10, %c0_11] : memref<4x1x128xf32, #tpu.memory_space<vmem>>, vector<4x1x128xf32>
    %cst_12 = arith.constant dense<0xFF800000> : vector<4x128xf32>
    %8 = vector.multi_reduction <maximumf>, %6, %cst_12 [1] : vector<4x128x128xf32> to vector<4x128xf32>
    %9 = vector.shape_cast %8 : vector<4x128xf32> to vector<4x1x128xf32>
    %10 = arith.maximumf %7, %9 : vector<4x1x128xf32>
    %11 = arith.subf %7, %10 : vector<4x1x128xf32>
    %12 = math.exp %11 : vector<4x1x128xf32>
    %13 = vector.broadcast %10 : vector<4x1x128xf32> to vector<4x128x128xf32>
    %14 = arith.subf %6, %13 : vector<4x128x128xf32>
    %15 = math.exp %14 : vector<4x128x128xf32>
    %c0_13 = arith.constant 0 : index
    %c0_14 = arith.constant 0 : index
    %c0_15 = arith.constant 0 : index
    %16 = vector.load %arg8[%c0_13, %c0_14, %c0_15] : memref<4x1x128xf32, #tpu.memory_space<vmem>>, vector<4x1x128xf32>
    %17 = arith.mulf %12, %16 : vector<4x1x128xf32>
    %cst_16 = arith.constant dense<0.000000e+00> : vector<4x128xf32>
    %18 = vector.multi_reduction <add>, %15, %cst_16 [1] : vector<4x128x128xf32> to vector<4x128xf32>
    %19 = vector.shape_cast %18 : vector<4x128xf32> to vector<4x1x128xf32>
    %20 = arith.addf %17, %19 : vector<4x1x128xf32>
    %c0_17 = arith.constant 0 : index
    %c0_18 = arith.constant 0 : index
    %c0_19 = arith.constant 0 : index
    %21 = vector.load %arg8[%c0_17, %c0_18, %c0_19] : memref<4x1x128xf32, #tpu.memory_space<vmem>>, vector<4x1x128xf32>
    tpu.vector_store %arg8[%c0_17, %c0_18, %c0_19], %20 {strides = array<i32>} : memref<4x1x128xf32, #tpu.memory_space<vmem>>, vector<4x1x128xf32>,
    %c0_20 = arith.constant 0 : index
    %c0_21 = arith.constant 0 : index
    %c0_22 = arith.constant 0 : index
    %22 = vector.load %arg7[%c0_20, %c0_21, %c0_22] : memref<4x1x128xf32, #tpu.memory_space<vmem>>, vector<4x1x128xf32>
    tpu.vector_store %arg7[%c0_20, %c0_21, %c0_22], %10 {strides = array<i32>} : memref<4x1x128xf32, #tpu.memory_space<vmem>>, vector<4x1x128xf32>,
    %cst_23 = arith.constant dense<0.000000e+00> : vector<4x16x128xf32>
    %23 = tpu.matmul %5, %15, %cst_23 {dimension_numbers = #tpu.dot_dimension_numbers<[2], [1], [1], [2], [0, 0, 0, 1, 1, 2], [0], [0]>} : vector<4x16x128xf32>, vector<4x128x128xf32>, vector<4x16x128xf32> -> vector<4x16x128xf32>
    %c0_24 = arith.constant 0 : index
    %c0_25 = arith.constant 0 : index
    %c0_26 = arith.constant 0 : index
    %24 = vector.load %arg9[%c0_24, %c0_25, %c0_26] : memref<4x16x128xf32, #tpu.memory_space<vmem>>, vector<4x16x128xf32>
    %25 = vector.broadcast %12 : vector<4x1x128xf32> to vector<4x16x128xf32>
    %26 = arith.mulf %25, %24 : vector<4x16x128xf32>
    %27 = arith.addf %26, %23 : vector<4x16x128xf32>
    %c0_27 = arith.constant 0 : index
    %c0_28 = arith.constant 0 : index
    %c0_29 = arith.constant 0 : index
    %28 = vector.load %arg9[%c0_27, %c0_28, %c0_29] : memref<4x16x128xf32, #tpu.memory_space<vmem>>, vector<4x16x128xf32>
    tpu.vector_store %arg9[%c0_27, %c0_28, %c0_29], %27 {strides = array<i32>} : memref<4x16x128xf32, #tpu.memory_space<vmem>>, vector<4x16x128xf32>,
    %c1_i32 = arith.constant 1 : i32
    %29 = arith.cmpi eq, %arg2, %c1_i32 : i32
    %30 = arith.extui %29 : i1 to i32
    %c0_i32_30 = arith.constant 0 : i32
    %31 = arith.cmpi ne, %30, %c0_i32_30 : i32
    scf.if %31 {
      %c0_31 = arith.constant 0 : index
      %c0_32 = arith.constant 0 : index
      %c0_33 = arith.constant 0 : index
      %32 = vector.load %arg8[%c0_31, %c0_32, %c0_33] : memref<4x1x128xf32, #tpu.memory_space<vmem>>, vector<4x1x128xf32>
      %33 = tpu.reciprocal %32 {approx = true} : vector<4x1x128xf32> -> vector<4x1x128xf32>
      %34 = arith.mulf %32, %33 : vector<4x1x128xf32>
      %cst_34 = arith.constant 2.000000e+00 : f32
      %35 = vector.broadcast %cst_34 : f32 to vector<4x1x128xf32>
      %36 = arith.subf %35, %34 : vector<4x1x128xf32>
      %37 = arith.mulf %33, %36 : vector<4x1x128xf32>
      %c0_35 = arith.constant 0 : index
      %c0_36 = arith.constant 0 : index
      %c0_37 = arith.constant 0 : index
      %38 = vector.load %arg9[%c0_35, %c0_36, %c0_37] : memref<4x16x128xf32, #tpu.memory_space<vmem>>, vector<4x16x128xf32>
      %39 = vector.broadcast %37 : vector<4x1x128xf32> to vector<4x16x128xf32>
      %40 = arith.mulf %38, %39 : vector<4x16x128xf32>
      %c0_38 = arith.constant 0 : index
      %c0_39 = arith.constant 0 : index
      %c0_40 = arith.constant 0 : index
      %41 = vector.load %arg6[%c0_38, %c0_39, %c0_40] : memref<4x16x128xf32, #tpu.memory_space<vmem>>, vector<4x16x128xf32>
      tpu.vector_store %arg6[%c0_38, %c0_39, %c0_40], %40 {strides = array<i32>} : memref<4x16x128xf32, #tpu.memory_space<vmem>>, vector<4x16x128xf32>,
    } else {
    }
    return
  }
  func.func @transform_0(%arg0: i32, %arg1: i32, %arg2: i32) -> (i32, i32, i32) {
    %c0_i32 = arith.constant 0 : i32
    %c0_i32_0 = arith.constant 0 : i32
    return %arg0, %c0_i32, %arg1 : i32, i32, i32
  }
  func.func @transform_1(%arg0: i32, %arg1: i32, %arg2: i32) -> (i32, i32, i32) {
    %c1_i32 = arith.constant 1 : i32
    %c0_i32 = arith.constant 0 : i32
    return %arg0, %c1_i32, %arg2 : i32, i32, i32
  }
  func.func @transform_2(%arg0: i32, %arg1: i32, %arg2: i32) -> (i32, i32, i32) {
    %c2_i32 = arith.constant 2 : i32
    %c0_i32 = arith.constant 0 : i32
    return %arg0, %c2_i32, %arg2 : i32, i32, i32
  }
  func.func @transform_3(%arg0: i32, %arg1: i32, %arg2: i32) -> (i32, i32, i32) {
    %c0_i32 = arith.constant 0 : i32
    %c0_i32_0 = arith.constant 0 : i32
    return %arg0, %c0_i32, %arg1 : i32, i32, i32
  }
}

</mosaic_0001>

<bundles_post_ra>
// kernel: tpu_custom_call.1
= control target key start
LH: loop header
LB: loop body
LE: loop exit
PB: predicated region body
PF: predicated region fallthrough
CT: control target
= control target key end

     0   :  { %8 = vsyncpa [#allocation7], 0  ;;  %s3228_s0 = inlined_call_operand.hbm [shape: f32[4,48,256], index: 0, kind: input, shape index: {}]   ;;  %s3229_s1 = inlined_call_operand.hbm [shape: f32[4,48,256], index: 1, kind: input, shape index: {}]   ;;  %s3230_s2 = inlined_call_operand.hbm [shape: f32[4,48,256], index: 2, kind: input, shape index: {}]   ;;  %s3231_s3 = inlined_call_operand.hbm [shape: f32[4,16,256], index: 3, kind: output, shape index: {}]  }
   0x1   :  { %10 = vsyncpa [#allocation7 + $0x1], 0 }
   0x2   :  { %11 = vsyncpa [#allocation10], 0 }
   0x3   :  { %13 = vsyncpa [#allocation10 + $0x1], 0 }
   0x4   :  { %14 = vsyncpa [#allocation8], 0 }
   0x5   :  { %16 = vsyncpa [#allocation8 + $0x1], 0  ;;  %s2353_s12 = smov 0   ;;  %s2355_s13 = smov 0  }
   0x6   :  { %s2357_s14 = smov 0   ;;  %s2359_s15 = smov 0  }
   0x7   :  { %s2361_s16 = smov 0   ;;  %s2363_s17 = smov 0  }
   0x8   :  { %s2365_s18 = smov 0   ;;  %s2367_s19 = smov 0  }
   0x9   :  { %s2369_s20 = smov 0   ;;  %s2371_s21 = smov 0  }
   0xa   :  { %s2373_s22 = smov 0  }
   0xb LB: > { %3245 = sst [smem:[#allocation25_spill]] %s2280_s15  ;;  %s2409_s23 = sadd.s32 4294967295, %s2308_s22   ;;  %s2308_s22 = sphi %s2373_s22, %s22_s22   ;;  %s2304_s21 = sphi %s2371_s21, %s3282_s21   ;;  %s2300_s20 = sphi %s2369_s20, %s3289_s20   ;;  %s2296_s19 = sphi %s2367_s19, %s3280_s19   ;;  %s2292_s18 = sphi %s2365_s18, %s3288_s18   ;;  %s2288_s17 = sphi %s2363_s17, %s3279_s17   ;;  %s2284_s16 = sphi %s2361_s16, %s3287_s16   ;;  %s2280_s15 = sphi %s2359_s15, %s3286_s15   ;;  %s2276_s14 = sphi %s2357_s14, %s3285_s14   ;;  %s2272_s13 = sphi %s2355_s13, %s3284_s13   ;;  %s2268_s12 = sphi %s2353_s12, %s3283_s12  }
   0xc   : > { %3246 = sst [smem:[#allocation26_spill]] %s2288_s17  ;;  %s1802_s24 = sadd.s32 4294967294, %s2308_s22  }
   0xd   : > { %3247 = sst [smem:[#allocation27_spill]] %s2304_s21  ;;  %s34_s25 = sadd.s32 1, %s2300_s20 }
   0xe   : > { %s37_s26 = sadd.s32 1, %s2304_s21  ;;  %p35_p0 = scmp.ge.s32.totalorder %s34_s25, 2 }
   0xf   : > { %s50_s27 = sadd.s32 1, %s2288_s17  ;;  %p57_p1 = scmp.ne.s32.totalorder %s2288_s17, %s2284_s16 }
  0x10   : > { %p58_p2 = scmp.eq.s32.totalorder %s2308_s22, 0  ;;  %s3291_s25 = smov (%p35_p0, %s34_s25), 0 }
  0x11   : > { %3248 = sst [smem:[#allocation28_spill]] %s3291_s25  ;;  %s3293_s26 = smov (!%p35_p0, %s37_s26), %s2304_s21 }
  0x12   : > { %p2426_p3 = por %p58_p2, %p57_p1  ;;  %p3232_p4 = scmp.ne.s32.totalorder %s2284_s16, %s2280_s15 }
  0x13   : > { %p39_p5 = scmp.ge.s32.totalorder %s3293_s26, 2  ;;  %p64_p6 = scmp.eq.s32.totalorder %s2409_s23, 0 }
  0x14   : > { %s74_s29 = ssub.s32 %s2300_s20, %s3291_s25  ;;  %s78_s30 = sadd.s32 1, %s2276_s14 }
  0x15   : > { %s3295_s26 = smov (%p39_p5, %s3293_s26), 0  ;;  %p2443_p7 = por %p64_p6, %p3232_p4 }
  0x16   : > { %3250 = sst [smem:[#allocation29_spill]] %s3295_s26  ;;  %p76_p8 = scmp.eq.s32.totalorder %s74_s29, 0 }
  0x17   : > { %s46_s5 = ssub.s32 %s2304_s21, %s3295_s26  ;;  %p85_p9 = scmp.ne.s32.totalorder %s2276_s14, %s2272_s13 }
  0x18   : > { %p48_p10 = scmp.eq.s32.totalorder %s46_s5, 0  ;;  %p91_p11 = scmp.ne.s32.totalorder %s2272_s13, %s2268_s12 }
  0x19   : > { %s2454_s6 = scalar_select %p76_p8, %s2276_s14, %s78_s30  }
  0x1a   : > { %s2457_s7 = scalar_select %p48_p10, %s2288_s17, %s50_s27  }
  0x1b   : > { %3252 = sst [smem:[#allocation30_spill]] %s2454_s6  ;;  %p2461_p12 = por %p85_p9, %p58_p2 }
  0x1c   : > { %3253 = sst [smem:[#allocation31_spill]] %s2457_s7  ;;  %p2467_p13 = por %p91_p11, %p64_p6 }
  0x1d   : > { %p145_p0 = scmp.eq.s32.totalorder %s2409_s23, 3  ;;  %p151_p5 = scmp.eq.s32.totalorder %s1802_s24, 3 }
  0x1e   : > { %p3257_p8 = scmp.ne.s32.totalorder %s2284_s16, %s2280_s15  ;;  %p1804_p2 = scmp.ge.s32.totalorder %s2308_s22, 4 }
  0x1f   : > { %p2475_p4 = por %p145_p0, %p57_p1 }
  0x20   : > { %p2482_p10 = por %p151_p5, %p3257_p8  ;;  %167 = sbr.rel (%p1804_p2) target bundleno = 79 (0x4f), region = 16 }
  0x22   : > { %s3258_s11 = scalar_select %p2482_p10, 1, 0 }
  0x24   : > { %3259 = sst [smem:[#allocation32_spill]] %s3258_s11 }
  0x25   : > { %s171_s12 = sand.u32 1, %s2288_s17   ;;  %s1806_s24 = sshll.u32 %s2304_s21, 3 }
  0x26   : > { %s1805_s27 = sshll.u32 %s171_s12, 6  ;;  %s182_s5 = scalar_lea.hbm %s3228_s0, %s1806_s24 }
  0x27   : > { %s1892_s26 = scalar_select %p2426_p3, [#allocation0], [#allocation19] }
  0x28   : > { %s195_s25 = sshll.u32 %s182_s5, 4  ;;  %s175_s7 = scalar_lea.vmem [#allocation6], %s1805_s27  ;;  %s196_s25 = int_to_ptr.hbm [resolvable:$true] %s195_s25 }
  0x29   : > { %s197_s6 = sshll.u32 %s175_s7, 4  ;;  %s187_s11 = sld [smem:[%s1892_s26]]   ;;  %s198_s6 = int_to_ptr.vmem [resolvable:$true] %s197_s6 }
  0x2a   : > { %s2310_s17 = smov 1536   ;;  %s2311_s21 = smov 256  }
  0x2b   : > { %1893 = sst [smem:[#allocation14]] (%p2426_p3), %s2310_s17  ;;  %s2312_s15 = smov 2  }
  0x2c   : > { %1894 = sst [smem:[#allocation14 + $0x1]] (%p2426_p3), %s2311_s21  ;;  %s2313_s29 = smov 128  }
  0x2d   : > { %1895 = sst [smem:[#allocation14 + $0x2]] (%p2426_p3), %s2312_s15  ;;  %s2314_s26 = smov 8  }
  0x2e   : > { %1896 = sst [smem:[#allocation14 + $0x3]] (%p2426_p3), %s2311_s21  ;;  %s172_s27 = scalar_lea.sflag [#allocation7], %s171_s12 }
  0x2f   : > { %s1807_s24 = sshll.u32 %s187_s11, 26  ;;  %1897 = sst [smem:[#allocation14 + $0x4]] (%p2426_p3), %s2313_s29 }
  0x30   : > { %s1808_s7 = sadd.s32 134217728, %s1807_s24  ;;  %1898 = sst [smem:[#allocation14 + $0x5]] (%p2426_p3), %s2314_s26 }
  0x31   : > { %s2315_s30 = smov [#allocation13]  }
  0x32   : > { %1899 = dma.general (%p2426_p3), %s196_s25, 1024, %s198_s6, %s172_s27, %s2315_s30, [#allocation14], %s1808_s7, 0  }
  0x33   : > { %s220_s15 = sand.u32 1, %s2308_s22   ;;  %s222_s17 = sand.u32 1, %s2276_s14  }
  0x34   : > { %s2510_s21 = sshll.u32 %s222_s17, 6  ;;  %s1810_s11 = sshll.u32 %s2300_s20, 3 }
  0x35   : > { %s1704_s25 = scalar_lea.hbm %s3229_s1, %s1810_s11  ;;  %s224_s28 = scalar_lea.vmem [#allocation9], %s2510_s21 }
  0x36   : > { %s247_s6 = sshll.u32 %s224_s28, 4  ;;  %s1705_s24 = scalar_lea.hbm %s1704_s25, 32  ;;  %s248_s6 = int_to_ptr.vmem [resolvable:$true] %s247_s6 }
  0x37   : > { %s1900_s29 = scalar_select %p2461_p12, [#allocation0], [#allocation20] }
  0x38   : > { %s245_s7 = sshll.u32 %s1705_s24, 4  ;;  %s2316_s27 = smov 1536   ;;  %s246_s7 = int_to_ptr.hbm [resolvable:$true] %s245_s7 }
  0x39   : > { %s237_s26 = sld [smem:[%s1900_s29]]   ;;  %s2317_s30 = smov 256  }
  0x3a   : > { %1901 = sst [smem:[#allocation16]] (%p2461_p12), %s2316_s27  ;;  %s2318_s17 = smov 2  }
  0x3b   : > { %1902 = sst [smem:[#allocation16 + $0x1]] (%p2461_p12), %s2317_s30  ;;  %s2319_s5 = smov 128  }
  0x3c   : > { %1903 = sst [smem:[#allocation16 + $0x2]] (%p2461_p12), %s2318_s17  ;;  %s2320_s25 = smov 8  }
  0x3d   : > { %1904 = sst [smem:[#allocation16 + $0x3]] (%p2461_p12), %s2317_s30  ;;  %s2533_s24 = scalar_lea.sflag [#allocation10], %s220_s15 }
  0x3e   : > { %1905 = sst [smem:[#allocation16 + $0x4]] (%p2461_p12), %s2319_s5  ;;  %s2321_s29 = smov [#allocation15]  }
  0x3f   : > { %s1811_s12 = sshll.u32 %s237_s26, 26  ;;  %1906 = sst [smem:[#allocation16 + $0x5]] (%p2461_p12), %s2320_s25 }
  0x40   : > { %s1812_s28 = sadd.s32 134217728, %s1811_s12 }
  0x41   : > { %1907 = dma.general (%p2461_p12), %s246_s7, 1024, %s248_s6, %s2533_s24, %s2321_s29, [#allocation16], %s1812_s28, 0  }
  0x42   : > { %s1712_s26 = scalar_lea.hbm %s3230_s2, %s1810_s11  ;;  %s274_s5 = scalar_lea.vmem [#allocation11], %s2510_s21 }
  0x43   : > { %s1713_s30 = scalar_lea.hbm %s1712_s26, 64  ;;  %s297_s15 = sshll.u32 %s274_s5, 4  ;;  %s298_s15 = int_to_ptr.vmem [resolvable:$true] %s297_s15 }
  0x44   : > { %s1908_s12 = scalar_select %p2461_p12, [#allocation0], [#allocation21] }
  0x45   : > { %s295_s25 = sshll.u32 %s1713_s30, 4  ;;  %s2322_s7 = smov 1536   ;;  %s296_s25 = int_to_ptr.hbm [resolvable:$true] %s295_s25 }
  0x46   : > { %s287_s6 = sld [smem:[%s1908_s12]]   ;;  %s2323_s28 = smov 256  }
  0x47   : > { %1909 = sst [smem:[#allocation18]] (%p2461_p12), %s2322_s7  ;;  %s2324_s11 = smov 2  }
  0x48   : > { %1910 = sst [smem:[#allocation18 + $0x1]] (%p2461_p12), %s2323_s28  ;;  %s2325_s29 = smov 128  }
  0x49   : > { %1911 = sst [smem:[#allocation18 + $0x2]] (%p2461_p12), %s2324_s11  ;;  %s2326_s17 = smov 8  }
  0x4a   : > { %1912 = sst [smem:[#allocation18 + $0x3]] (%p2461_p12), %s2323_s28  ;;  %s2327_s26 = smov [#allocation17]  }
  0x4b   : > { %1913 = sst [smem:[#allocation18 + $0x4]] (%p2461_p12), %s2325_s29 }
  0x4c   : > { %s1815_s21 = sshll.u32 %s287_s6, 26  ;;  %1914 = sst [smem:[#allocation18 + $0x5]] (%p2461_p12), %s2326_s17 }
  0x4d   : > { %s1816_s27 = sadd.s32 134217728, %s1815_s21 }
  0x4e   : > { %1915 = dma.general (%p2461_p12), %s296_s25, 1024, %s298_s15, %s2533_s24, %s2327_s26, [#allocation18], %s1816_s27, 0  }
  0x4f PF: > { %p1817_p1 = scmp.ge.s32.totalorder %s2308_s22, 1  ;;  %p318_p3 = scmp.lt.s32.totalorder %s2308_s22, 5 }
  0x51   : > { %p319_p6 = pnand %p1817_p1, %p318_p3 }
  0x53   : > { %322 = sbr.rel (%p319_p6) target bundleno = 909 (0x38d), region = 32 }
  0x58   : > { %s2564_s30 = sand.u32 1, %s2284_s16  }
  0x59   : > { %s1818_s5 = sshll.u32 %s2564_s30, 6  ;;  %s325_s12 = scalar_lea.sflag [#allocation7], %s2564_s30 }
  0x5a   : > { %s2568_s6 = scalar_lea.vmem [#allocation6], %s1818_s5 }
  0x5b   : > { %2255 = dma.done.wait (%p2443_p7), %s325_s12, 1024  }
  0x5c   : > { %2257 = vsyncadd (%p2443_p7), %s325_s12, 4294966272  ;;  %s334_s8 = sand.u32 1, %s2409_s23   ;;  %s336_s24 = sand.u32 1, %s2272_s13  }
  0x5d   : > { %s1819_s15 = sshll.u32 %s336_s24, 6  ;;  %s335_s25 = scalar_lea.sflag [#allocation10], %s334_s8 }
  0x5e   : > { %s2576_s7 = scalar_lea.vmem [#allocation9], %s1819_s15 }
  0x5f   : > { %2259 = dma.done.wait (%p2467_p13), %s335_s25, 2048  }
  0x60   : > { %2261 = vsyncadd (%p2467_p13), %s335_s25, 4294965248  ;;  %s2582_s28 = scalar_lea.vmem [#allocation11], %s1819_s15  ;;  %s2584_s11 = scalar_lea.vmem [#allocation12], %s1818_s5 }
  0x61   : > { %p1822_p7 = scmp.ne.s32.totalorder %s2292_s18, 0 }
  0x63   : > { %389 = sbr.rel (%p1822_p7) target bundleno = 129 (0x81), region = 48 }
  0x68   : > { %v2328_v0 = vmov -inf   ;;  %v2329_v1 = vmov 0.0   ;;  %v406_v2 = vld [vmem:[%s2568_s6] sm:$0xff]  ;;  %v407_v3 = vld [vmem:[%s2568_s6 + $0x8] sm:$0xff]  ;;  %v408_v4 = vld [vmem:[%s2568_s6 + $0x10] sm:$0xff] }
  0x69   : > { %390 = vst [vmem:[#allocation2] sm:$0x1] %v2328_v0  ;;  %v414_v5 = vmul.f32 0.25, %v406_v2  ;;  %v409_v6 = vld [vmem:[%s2568_s6 + $0x18] sm:$0xff]  ;;  %v415_v7 = vmul.f32 0.25, %v407_v3  ;;  %v410_v8 = vld [vmem:[%s2568_s6 + $0x20] sm:$0xff] }
  0x6a   : > { %391 = vst [vmem:[#allocation2 + $0x1] sm:$0x1] %v2328_v0  ;;  %v416_v9 = vmul.f32 0.25, %v408_v4  ;;  %v411_v10 = vld [vmem:[%s2568_s6 + $0x28] sm:$0xff]  ;;  %v417_v11 = vmul.f32 0.25, %v409_v6  ;;  %v412_v12 = vld [vmem:[%s2568_s6 + $0x30] sm:$0xff] }
  0x6b   : > { %392 = vst [vmem:[#allocation2 + $0x2] sm:$0x1] %v2328_v0  ;;  %v418_v13 = vmul.f32 0.25, %v410_v8  ;;  %v413_v14 = vld [vmem:[%s2568_s6 + $0x38] sm:$0xff]  ;;  %v419_v15 = vmul.f32 0.25, %v411_v10  ;;  %v420_v16 = vmul.f32 0.25, %v412_v12 }
  0x6c   : > { %393 = vst [vmem:[#allocation2 + $0x3] sm:$0x1] %v2328_v0  ;;  %v421_v17 = vmul.f32 0.25, %v413_v14 }
  0x6d   : > { %394 = vst [vmem:[#allocation3] sm:$0x1] %v2329_v1 }
  0x6e   : > { %395 = vst [vmem:[#allocation3 + $0x1] sm:$0x1] %v2329_v1 }
  0x6f   : > { %396 = vst [vmem:[#allocation3 + $0x2] sm:$0x1] %v2329_v1 }
  0x70   : > { %397 = vst [vmem:[#allocation3 + $0x3] sm:$0x1] %v2329_v1 }
  0x71   : > { %398 = vst [vmem:[#allocation4 + $0x30] sm:$0xff] %v2329_v1 }
  0x72   : > { %399 = vst [vmem:[#allocation4] sm:$0xff] %v2329_v1 }
  0x73   : > { %400 = vst [vmem:[#allocation4 + $0x18] sm:$0xff] %v2329_v1 }
  0x74   : > { %401 = vst [vmem:[#allocation4 + $0x10] sm:$0xff] %v2329_v1 }
  0x75   : > { %402 = vst [vmem:[#allocation4 + $0x8] sm:$0xff] %v2329_v1 }
  0x76   : > { %403 = vst [vmem:[#allocation4 + $0x20] sm:$0xff] %v2329_v1 }
  0x77   : > { %404 = vst [vmem:[#allocation4 + $0x28] sm:$0xff] %v2329_v1 }
  0x78   : > { %405 = vst [vmem:[#allocation4 + $0x38] sm:$0xff] %v2329_v1 }
  0x79   : > { %422 = vst [vmem:[#allocation5] sm:$0xff] %v414_v5 }
  0x7a   : > { %423 = vst [vmem:[#allocation5 + $0x18] sm:$0xff] %v415_v7 }
  0x7b   : > { %424 = vst [vmem:[#allocation5 + $0x10] sm:$0xff] %v416_v9 }
  0x7c   : > { %425 = vst [vmem:[#allocation5 + $0x20] sm:$0xff] %v417_v11 }
  0x7d   : > { %426 = vst [vmem:[#allocation5 + $0x28] sm:$0xff] %v418_v13 }
  0x7e   : > { %427 = vst [vmem:[#allocation5 + $0x8] sm:$0xff] %v419_v15 }
  0x7f   : > { %428 = vst [vmem:[#allocation5 + $0x30] sm:$0xff] %v420_v16 }
  0x80   : > { %429 = vst [vmem:[#allocation5 + $0x38] sm:$0xff] %v421_v17 }
  0x81 PF: > { %v444_v18 = vld [vmem:[%s2576_s7 + $0x30] sm:$0xff]  ;;  %v442_v19 = vld [vmem:[%s2576_s7 + $0x20] sm:$0xff]  ;;  %v445_v21 = vld [vmem:[%s2576_s7 + $0x38] sm:$0xff]  ;;  %vm486_vm0 = vcmask 130048   ;;  %p1887_p9 = scmp.ne.s32.totalorder %s2292_s18, 1 }
  0x82   : > { %v438_v20 = vld [vmem:[%s2576_s7] sm:$0xff]  ;;  %890 = vxpose.xlu1.b32.start [1/2] (short) %v444_v18, 128  ;;  %745 = vxpose.xlu0.b32.start [1/2] (short) %v442_v19, 128  ;;  %v443_v22 = vld [vmem:[%s2576_s7 + $0x28] sm:$0xff]  ;;  %v431_v24 = vld [vmem:[#allocation5 + $0x18] sm:$0xff] }
  0x83   : > { %454 = vxpose.xlu2.b32.start [1/2] (short) %v438_v20, 128  ;;  %v439_v23 = vld [vmem:[%s2576_s7 + $0x8] sm:$0xff]  ;;  %549 = vmatpush.msra.mxu0 %v431_v24  ;;  %v430_v25 = vld [vmem:[#allocation5] sm:$0xff]  ;;  %v440_v26 = vld [vmem:[%s2576_s7 + $0x10] sm:$0xff] }
  0x84   : > { %v434_v29 = vld [vmem:[#allocation5 + $0x28] sm:$0xff]  ;;  %v441_v31 = vld [vmem:[%s2576_s7 + $0x18] sm:$0xff]  ;;  %v433_v5 = vld [vmem:[#allocation5 + $0x20] sm:$0xff] }
  0x85   : > { %550 = vmatpush.msra.mxu0 %v430_v25  ;;  %v435_v27 = vld [vmem:[#allocation5 + $0x8] sm:$0xff]  ;;  %694 = vmatpush.msra.mxu1 %v433_v5  ;;  %v432_v9 = vld [vmem:[#allocation5 + $0x10] sm:$0xff] }
  0x86   : > { %839 = vmatpush.msra.mxu2 %v435_v27  ;;  %v436_v30 = vld [vmem:[#allocation5 + $0x30] sm:$0xff] }
  0x87   : > { %v437_v28 = vld [vmem:[#allocation5 + $0x38] sm:$0xff]  ;;  %695 = vmatpush.msra.mxu1 %v432_v9 }
  0x88   : > { %984 = vmatpush.msra.mxu3 %v437_v28  ;;  %840 = vmatpush.msra.mxu2 %v434_v29 }
  0x8a   : > { %891 = vxpose.xlu1.b32.end [2/2] (short) %v445_v21, 128  ;;  %746 = vxpose.xlu0.b32.end [2/2] (short) %v443_v22, 128 }
  0x8b   : > { %455 = vxpose.xlu2.b32.end [2/2] (short) %v439_v23, 128  ;;  %985 = vmatpush.msra.mxu3 %v436_v30 }
 0x102   : > { %600 = vxpose.xlu0.b32.start [1/2] (short) %v440_v26, 128 }
 0x10a   : > { %601 = vxpose.xlu0.b32.end [2/2] (short) %v441_v31, 128 }
 0x11c   : > { %v470_v32 = vpop.trf.xlu2 }
 0x11d   : > { %1823 = vmatmul.msk.f32.vlgmr.msra.gmra.mxu0 %vm486_vm0, %v470_v32 }
 0x124   : > { %v471_v33 = vpop.trf.xlu2 }
 0x125   : > { %1824 = vmatmul.msk.f32.gmra.mxu0 %vm486_vm0, %v471_v33 }
 0x126   : > { %v906_v34 = vpop.trf.xlu1  ;;  %v761_v35 = vpop.trf.xlu0 }
 0x127   : > { %1855 = vmatmul.msk.f32.vlgmr.msra.gmra.mxu2 %vm486_vm0, %v761_v35  ;;  %1871 = vmatmul.msk.f32.vlgmr.msra.gmra.mxu3 %vm486_vm0, %v906_v34 }
 0x12c   : > { %v472_v36 = vpop.trf.xlu2 }
 0x12d   : > { %1825 = vmatmul.msk.f32.gmra.mxu0 %vm486_vm0, %v472_v36 }
 0x12e   : > { %v907_v37 = vpop.trf.xlu1  ;;  %v762_v38 = vpop.trf.xlu0 }
 0x12f   : > { %1856 = vmatmul.msk.f32.gmra.mxu2 %vm486_vm0, %v762_v38  ;;  %1872 = vmatmul.msk.f32.gmra.mxu3 %vm486_vm0, %v907_v37 }
 0x134   : > { %v473_v39 = vpop.trf.xlu2 }
 0x135   : > { %1826 = vmatmul.msk.f32.gmra.mxu0 %vm486_vm0, %v473_v39 }
 0x136   : > { %v908_v40 = vpop.trf.xlu1  ;;  %v763_v41 = vpop.trf.xlu0 }
 0x137   : > { %1857 = vmatmul.msk.f32.gmra.mxu2 %vm486_vm0, %v763_v41  ;;  %1873 = vmatmul.msk.f32.gmra.mxu3 %vm486_vm0, %v908_v40 }
 0x13c   : > { %v474_v42 = vpop.trf.xlu2 }
 0x13d   : > { %1827 = vmatmul.msk.f32.gmra.mxu0 %vm486_vm0, %v474_v42 }
 0x13e   : > { %v909_v43 = vpop.trf.xlu1  ;;  %v764_v44 = vpop.trf.xlu0 }
 0x13f   : > { %1858 = vmatmul.msk.f32.gmra.mxu2 %vm486_vm0, %v764_v44  ;;  %1874 = vmatmul.msk.f32.gmra.mxu3 %vm486_vm0, %v909_v43 }
 0x144   : > { %v475_v45 = vpop.trf.xlu2 }
 0x145   : > { %1828 = vmatmul.msk.f32.gmra.mxu0 %vm486_vm0, %v475_v45 }
 0x146   : > { %v910_v46 = vpop.trf.xlu1  ;;  %v765_v47 = vpop.trf.xlu0 }
 0x147   : > { %1859 = vmatmul.msk.f32.gmra.mxu2 %vm486_vm0, %v765_v47  ;;  %1875 = vmatmul.msk.f32.gmra.mxu3 %vm486_vm0, %v910_v46 }
 0x14c   : > { %v476_v48 = vpop.trf.xlu2 }
 0x14d   : > { %1829 = vmatmul.msk.f32.gmra.mxu0 %vm486_vm0, %v476_v48 }
 0x14e   : > { %v911_v49 = vpop.trf.xlu1  ;;  %v766_v50 = vpop.trf.xlu0 }
 0x14f   : > { %1860 = vmatmul.msk.f32.gmra.mxu2 %vm486_vm0, %v766_v50  ;;  %1876 = vmatmul.msk.f32.gmra.mxu3 %vm486_vm0, %v911_v49 }
 0x154   : > { %v477_v51 = vpop.trf.xlu2 }
 0x155   : > { %1830 = vmatmul.msk.f32.gmra.mxu0 %vm486_vm0, %v477_v51 }
 0x156   : > { %v912_v52 = vpop.trf.xlu1  ;;  %v767_v53 = vpop.trf.xlu0 }
 0x157   : > { %1861 = vmatmul.msk.f32.gmra.mxu2 %vm486_vm0, %v767_v53  ;;  %1877 = vmatmul.msk.f32.gmra.mxu3 %vm486_vm0, %v912_v52 }
 0x15c   : > { %v478_v54 = vpop.trf.xlu2 }
 0x15d   : > { %1831 = vmatmul.msk.f32.gmra.mxu0 %vm486_vm0, %v478_v54 }
 0x15e   : > { %v913_v55 = vpop.trf.xlu1  ;;  %v768_v56 = vpop.trf.xlu0 }
 0x15f   : > { %1862 = vmatmul.msk.f32.gmra.mxu2 %vm486_vm0, %v768_v56  ;;  %1878 = vmatmul.msk.f32.gmra.mxu3 %vm486_vm0, %v913_v55 }
 0x164   : > { %v479_v57 = vpop.trf.xlu2 }
 0x165   : > { %1832 = vmatmul.msk.f32.gmra.mxu0 %vm486_vm0, %v479_v57 }
 0x166   : > { %v914_v58 = vpop.trf.xlu1  ;;  %v769_v59 = vpop.trf.xlu0 }
 0x167   : > { %1863 = vmatmul.msk.f32.gmra.mxu2 %vm486_vm0, %v769_v59  ;;  %1879 = vmatmul.msk.f32.gmra.mxu3 %vm486_vm0, %v914_v58 }
 0x16c   : > { %v480_v60 = vpop.trf.xlu2 }
 0x16d   : > { %1833 = vmatmul.msk.f32.gmra.mxu0 %vm486_vm0, %v480_v60 }
 0x16e   : > { %v915_v61 = vpop.trf.xlu1  ;;  %v770_v62 = vpop.trf.xlu0 }
 0x16f   : > { %1864 = vmatmul.msk.f32.gmra.mxu2 %vm486_vm0, %v770_v62  ;;  %1880 = vmatmul.msk.f32.gmra.mxu3 %vm486_vm0, %v915_v61 }
 0x174   : > { %v481_v63 = vpop.trf.xlu2 }
 0x175   : > { %1834 = vmatmul.msk.f32.gmra.mxu0 %vm486_vm0, %v481_v63 }
 0x176   : > { %v916_v0 = vpop.trf.xlu1  ;;  %v771_v1 = vpop.trf.xlu0 }
 0x177   : > { %1865 = vmatmul.msk.f32.gmra.mxu2 %vm486_vm0, %v771_v1  ;;  %1881 = vmatmul.msk.f32.gmra.mxu3 %vm486_vm0, %v916_v0 }
 0x17c   : > { %v482_v2 = vpop.trf.xlu2 }
 0x17d   : > { %1835 = vmatmul.msk.f32.gmra.mxu0 %vm486_vm0, %v482_v2 }
 0x17e   : > { %v917_v3 = vpop.trf.xlu1  ;;  %v772_v4 = vpop.trf.xlu0 }
 0x17f   : > { %1866 = vmatmul.msk.f32.gmra.mxu2 %vm486_vm0, %v772_v4  ;;  %1882 = vmatmul.msk.f32.gmra.mxu3 %vm486_vm0, %v917_v3 }
 0x184   : > { %v483_v6 = vpop.trf.xlu2 }
 0x185   : > { %1836 = vmatmul.msk.f32.gmra.mxu0 %vm486_vm0, %v483_v6 }
 0x186   : > { %v918_v7 = vpop.trf.xlu1  ;;  %v773_v8 = vpop.trf.xlu0 }
 0x187   : > { %1867 = vmatmul.msk.f32.gmra.mxu2 %vm486_vm0, %v773_v8  ;;  %1883 = vmatmul.msk.f32.gmra.mxu3 %vm486_vm0, %v918_v7 }
 0x18c   : > { %v484_v10 = vpop.trf.xlu2 }
 0x18d   : > { %1837 = vmatmul.msk.f32.gmra.mxu0 %vm486_vm0, %v484_v10 }
 0x18e   : > { %v919_v11 = vpop.trf.xlu1  ;;  %v774_v12 = vpop.trf.xlu0 }
 0x18f   : > { %1868 = vmatmul.msk.f32.gmra.mxu2 %vm486_vm0, %v774_v12  ;;  %1884 = vmatmul.msk.f32.gmra.mxu3 %vm486_vm0, %v919_v11 }
 0x194   : > { %v485_v13 = vpop.trf.xlu2 }
 0x195   : > { %1838 = vmatmul.msk.f32.gmra.mxu0 %vm486_vm0, %v485_v13 }
 0x196   : > { %v920_v14 = vpop.trf.xlu1  ;;  %v775_v15 = vpop.trf.xlu0 }
 0x197   : > { %1869 = vmatmul.msk.f32.gmra.mxu2 %vm486_vm0, %v775_v15  ;;  %1885 = vmatmul.msk.f32.gmra.mxu3 %vm486_vm0, %v920_v14 }
 0x19a   : > { %v2649_v16 = vpop.f32.mrf.mxu0 }
 0x19e   : > { %v921_v17 = vpop.trf.xlu1  ;;  %v776_v18 = vpop.trf.xlu0 }
 0x19f   : > { %1870 = vmatmul.msk.f32.gmra.mxu2 %vm486_vm0, %v776_v18  ;;  %1886 = vmatmul.msk.f32.gmra.mxu3 %vm486_vm0, %v921_v17 }
 0x1a2   : > { %v2653_v19 = vpop.f32.mrf.mxu0 }
 0x1a3   : > { %v1039_v47 = vmax.f32 %v2649_v16, %v2653_v19 }
 0x1a6   : > { %v616_v20 = vpop.trf.xlu0 }
 0x1a7   : > { %1839 = vmatmul.msk.f32.vlgmr.msra.gmra.mxu1 %vm486_vm0, %v616_v20 }
 0x1aa   : > { %v2656_v21 = vpop.f32.mrf.mxu0  ;;  %v2658_v22 = vpop.f32.mrf.mxu2 }
 0x1ab   : > { %3260 = vst [vmem:[#allocation33_spill] sm:$0xff] %v2658_v22  ;;  %v2660_v23 = vpop.f32.mrf.mxu3  ;;  %v1040_v50 = vmax.f32 %v1039_v47, %v2656_v21 }
 0x1ac   : > { %3261 = vst [vmem:[#allocation34_spill] sm:$0xff] %v2660_v23 }
 0x1ae   : > { %v617_v24 = vpop.trf.xlu0 }
 0x1af   : > { %1840 = vmatmul.msk.f32.gmra.mxu1 %vm486_vm0, %v617_v24 }
 0x1b2   : > { %v2663_v25 = vpop.f32.mrf.mxu0  ;;  %v2665_v26 = vpop.f32.mrf.mxu2 }
 0x1b3   : > { %3262 = vst [vmem:[#allocation35_spill] sm:$0xff] %v2665_v26  ;;  %v2667_v27 = vpop.f32.mrf.mxu3  ;;  %v1041_v53 = vmax.f32 %v1040_v50, %v2663_v25 }
 0x1b4   : > { %3263 = vst [vmem:[#allocation36_spill] sm:$0xff] %v2667_v27  ;;  %v1102_v61 = vmax.f32 %v2660_v23, %v2667_v27 }
 0x1b6   : > { %v618_v28 = vpop.trf.xlu0 }
 0x1b7   : > { %1841 = vmatmul.msk.f32.gmra.mxu1 %vm486_vm0, %v618_v28 }
 0x1ba   : > { %v2670_v29 = vpop.f32.mrf.mxu0  ;;  %v2672_v30 = vpop.f32.mrf.mxu2 }
 0x1bb   : > { %v2674_v31 = vpop.f32.mrf.mxu3  ;;  %v1042_v56 = vmax.f32 %v1041_v53, %v2670_v29 }
 0x1bc   : > { %v1103_v0 = vmax.f32 %v1102_v61, %v2674_v31 }
 0x1be   : > { %v619_v32 = vpop.trf.xlu0 }
 0x1bf   : > { %1842 = vmatmul.msk.f32.gmra.mxu1 %vm486_vm0, %v619_v32 }
 0x1c2   : > { %v2677_v33 = vpop.f32.mrf.mxu0  ;;  %v2679_v34 = vpop.f32.mrf.mxu2 }
 0x1c3   : > { %v2681_v35 = vpop.f32.mrf.mxu3  ;;  %v1043_v59 = vmax.f32 %v1042_v56, %v2677_v33 }
 0x1c4   : > { %v1104_v5 = vmax.f32 %v1103_v0, %v2681_v35 }
 0x1c6   : > { %v620_v36 = vpop.trf.xlu0 }
 0x1c7   : > { %1843 = vmatmul.msk.f32.gmra.mxu1 %vm486_vm0, %v620_v36 }
 0x1ca   : > { %v2684_v37 = vpop.f32.mrf.mxu0  ;;  %v2686_v38 = vpop.f32.mrf.mxu2 }
 0x1cb   : > { %v2688_v39 = vpop.f32.mrf.mxu3  ;;  %v1044_v63 = vmax.f32 %v1043_v59, %v2684_v37 }
 0x1cc   : > { %v1105_v8 = vmax.f32 %v1104_v5, %v2688_v39 }
 0x1ce   : > { %v621_v40 = vpop.trf.xlu0 }
 0x1cf   : > { %1844 = vmatmul.msk.f32.gmra.mxu1 %vm486_vm0, %v621_v40  ;;  %v1081_v40 = vmax.f32 %v2658_v22, %v2665_v26 }
 0x1d2   : > { %v2691_v41 = vpop.f32.mrf.mxu0  ;;  %v2693_v42 = vpop.f32.mrf.mxu2 }
 0x1d3   : > { %v2695_v43 = vpop.f32.mrf.mxu3  ;;  %v1045_v3 = vmax.f32 %v1044_v63, %v2691_v41 }
 0x1d4   : > { %v1106_v13 = vmax.f32 %v1105_v8, %v2695_v43 }
 0x1d6   : > { %v622_v44 = vpop.trf.xlu0 }
 0x1d7   : > { %1845 = vmatmul.msk.f32.gmra.mxu1 %vm486_vm0, %v622_v44 }
 0x1da   : > { %v2698_v45 = vpop.f32.mrf.mxu0  ;;  %v2700_v46 = vpop.f32.mrf.mxu2 }
 0x1db   : > { %v2704_v48 = vpop.f32.mrf.mxu3  ;;  %v1046_v7 = vmax.f32 %v1045_v3, %v2698_v45 }
 0x1dc   : > { %v1107_v17 = vmax.f32 %v1106_v13, %v2704_v48 }
 0x1de   : > { %v623_v49 = vpop.trf.xlu0 }
 0x1df   : > { %1846 = vmatmul.msk.f32.gmra.mxu1 %vm486_vm0, %v623_v49  ;;  %v1082_v49 = vmax.f32 %v1081_v40, %v2672_v30 }
 0x1e2   : > { %v2708_v51 = vpop.f32.mrf.mxu0  ;;  %v2710_v52 = vpop.f32.mrf.mxu2 }
 0x1e3   : > { %v2713_v54 = vpop.f32.mrf.mxu3  ;;  %v1047_v11 = vmax.f32 %v1046_v7, %v2708_v51 }
 0x1e4   : > { %v1108_v32 = vmax.f32 %v1107_v17, %v2713_v54 }
 0x1e6   : > { %v624_v55 = vpop.trf.xlu0 }
 0x1e7   : > { %1847 = vmatmul.msk.f32.gmra.mxu1 %vm486_vm0, %v624_v55  ;;  %v1083_v55 = vmax.f32 %v1082_v49, %v2679_v34 }
 0x1ea   : > { %v2717_v57 = vpop.f32.mrf.mxu0  ;;  %v2719_v58 = vpop.f32.mrf.mxu2 }
 0x1eb   : > { %v2722_v60 = vpop.f32.mrf.mxu3  ;;  %v1048_v15 = vmax.f32 %v1047_v11, %v2717_v57 }
 0x1ec   : > { %v1109_v47 = vmax.f32 %v1108_v32, %v2722_v60 }
 0x1ee   : > { %v625_v62 = vpop.trf.xlu0 }
 0x1ef   : > { %1848 = vmatmul.msk.f32.gmra.mxu1 %vm486_vm0, %v625_v62  ;;  %v1084_v62 = vmax.f32 %v1083_v55, %v2686_v38 }
 0x1f1   : > { %v1085_v0 = vmax.f32 %v1084_v62, %v2693_v42 }
 0x1f2   : > { %v2729_v1 = vpop.f32.mrf.mxu0  ;;  %v2731_v2 = vpop.f32.mrf.mxu2 }
 0x1f3   : > { %v2734_v4 = vpop.f32.mrf.mxu3  ;;  %v1049_v24 = vmax.f32 %v1048_v15, %v2729_v1 }
 0x1f4   : > { %v1110_v61 = vmax.f32 %v1109_v47, %v2734_v4 }
 0x1f6   : > { %v626_v6 = vpop.trf.xlu0 }
 0x1f7   : > { %1849 = vmatmul.msk.f32.gmra.mxu1 %vm486_vm0, %v626_v6  ;;  %v1086_v6 = vmax.f32 %v1085_v0, %v2700_v46 }
 0x1f9   : > { %v1087_v11 = vmax.f32 %v1086_v6, %v2710_v52 }
 0x1fa   : > { %v2740_v9 = vpop.f32.mrf.mxu0  ;;  %v2742_v10 = vpop.f32.mrf.mxu2 }
 0x1fb   : > { %v2745_v12 = vpop.f32.mrf.mxu3  ;;  %v1050_v44 = vmax.f32 %v1049_v24, %v2740_v9  ;;  %v1088_v17 = vmax.f32 %v1087_v11, %v2719_v58 }
 0x1fc   : > { %v1111_v5 = vmax.f32 %v1110_v61, %v2745_v12 }
 0x1fe   : > { %v627_v14 = vpop.trf.xlu0 }
 0x1ff   : > { %1850 = vmatmul.msk.f32.gmra.mxu1 %vm486_vm0, %v627_v14 }
 0x202   : > { %v2751_v18 = vpop.f32.mrf.mxu0  ;;  %v2753_v20 = vpop.f32.mrf.mxu2 }
 0x203   : > { %v2756_v28 = vpop.f32.mrf.mxu3  ;;  %v1051_v56 = vmax.f32 %v1050_v44, %v2751_v18 }
 0x204   : > { %v1112_v15 = vmax.f32 %v1111_v5, %v2756_v28  ;;  %v2795_v5 = vld [vmem:[#allocation2] sm:$0x1] }
 0x206   : > { %v628_v36 = vpop.trf.xlu0 }
 0x207   : > { %1851 = vmatmul.msk.f32.gmra.mxu1 %vm486_vm0, %v628_v36  ;;  %v1089_v36 = vmax.f32 %v1088_v17, %v2731_v2 }
 0x209   : > { %v1090_v47 = vmax.f32 %v1089_v36, %v2742_v10 }
 0x20a   : > { %v594_v50 = vpop.f32.mrf.mxu0  ;;  %v2765_v53 = vpop.f32.mrf.mxu2 }
 0x20b   : > { %v2769_v59 = vpop.f32.mrf.mxu3  ;;  %v1052_v3 = vmax.f32 %v1051_v56, %v594_v50  ;;  %v1091_v56 = vmax.f32 %v1090_v47, %v2753_v20 }
 0x20c   : > { %v1113_v44 = vmax.f32 %v1112_v15, %v2769_v59 }
 0x20d   : > { %v1092_v0 = vmax.f32 %v1091_v56, %v2765_v53 }
 0x20e   : > { %v629_v63 = vpop.trf.xlu0 }
 0x20f   : > { %1852 = vmatmul.msk.f32.gmra.mxu1 %vm486_vm0, %v629_v63 }
 0x212   : > { %v597_v7 = vpop.f32.mrf.mxu0  ;;  %v2777_v8 = vpop.f32.mrf.mxu2 }
 0x213   : > { %v1053_v13 = vmax.f32 %v1052_v3, %v597_v7  ;;  %v2780_v14 = vpop.f32.mrf.mxu3 }
 0x214   : > { %v1114_v63 = vmax.f32 %v1113_v44, %v2780_v14 }
 0x215   : > { %v1054_v24 = vrot.slane %v1053_v13, 4 }
 0x216   : > { %v630_v32 = vpop.trf.xlu0 }
 0x217   : > { %v1055_v40 = vmax.f32 %v1053_v13, %v1054_v24  ;;  %1853 = vmatmul.msk.f32.gmra.mxu1 %vm486_vm0, %v630_v32  ;;  %v1093_v13 = vmax.f32 %v1092_v0, %v2777_v8 }
 0x219   : > { %v1056_v49 = vrot.slane %v1055_v40, 2 }
 0x21a   : > { %v2788_v55 = vpop.f32.mrf.mxu2 }
 0x21b   : > { %v1057_v61 = vmax.f32 %v1055_v40, %v1056_v49  ;;  %v2791_v62 = vpop.f32.mrf.mxu3  ;;  %v1094_v24 = vmax.f32 %v1093_v13, %v2788_v55 }
 0x21c   : > { %v1115_v15 = vmax.f32 %v1114_v63, %v2791_v62 }
 0x21d   : > { %v1058_v3 = vrot.slane %v1057_v61, 1 }
 0x21e   : > { %v631_v6 = vpop.trf.xlu0 }
 0x21f   : > { %v1059_v11 = vmax.f32 %v1057_v61, %v1058_v3  ;;  %1854 = vmatmul.msk.f32.gmra.mxu1 %vm486_vm0, %v631_v6 }
 0x221   : > { %v2801_v17 = vmax.f32 %v2795_v5, %v1059_v11 }
 0x222   : > { %v2804_v32 = vpop.f32.mrf.mxu2 }
 0x223   : > { %v2807_v36 = vperm.slane %v2801_v17, 0  ;;  %1443 = vst [vmem:[#allocation2] sm:$0x1] %v2801_v17  ;;  %v1095_v40 = vmax.f32 %v1094_v24, %v2804_v32  ;;  %v2811_v44 = vpop.f32.mrf.mxu3 }
 0x224   : > { %v1116_v47 = vmax.f32 %v1115_v15, %v2811_v44  ;;  %v2814_v49 = vpop.f32.mrf.mxu1 }
 0x225   : > { %3264 = vst [vmem:[#allocation37_spill] sm:$0xff] %v2814_v49  ;;  %v1166_v56 = vsub.f32 %v597_v7, %v2807_v36  ;;  %v1096_v61 = vrot.slane %v1095_v40, 4  ;;  %v1165_v63 = vsub.f32 %v594_v50, %v2807_v36  ;;  %v1164_v0 = vsub.f32 %v2751_v18, %v2807_v36 }
 0x226   : > { %v1117_v3 = vrot.slane %v1116_v47, 4  ;;  %v1163_v6 = vsub.f32 %v2740_v9, %v2807_v36  ;;  %v1162_v11 = vsub.f32 %v2729_v1, %v2807_v36  ;;  %v1161_v50 = vsub.f32 %v2717_v57, %v2807_v36 }
 0x227   : > { %v1245_v13 = vmul.f32 1.442695, %v1166_v56  ;;  %v1097_v24 = vmax.f32 %v1095_v40, %v1096_v61  ;;  %v1243_v15 = vmul.f32 1.442695, %v1165_v63  ;;  %v1241_v23 = vmul.f32 1.442695, %v1164_v0 }
 0x228   : > { %v1118_v49 = vmax.f32 %v1116_v47, %v1117_v3  ;;  %v1239_v22 = vmul.f32 1.442695, %v1163_v6  ;;  %v1160_v18 = vsub.f32 %v2708_v51, %v2807_v36  ;;  %v1237_v26 = vmul.f32 1.442695, %v1162_v11  ;;  %v2836_v0 = vld [vmem:[#allocation2 + $0x2] sm:$0x1] }
 0x229   : > { %2038 = vpow2.f32 %v1245_v13  ;;  %v1098_v7 = vrot.slane %v1097_v24, 2  ;;  %v1159_v1 = vsub.f32 %v2698_v45, %v2807_v36  ;;  %v1158_v47 = vsub.f32 %v2691_v41, %v2807_v36 }
 0x22a   : > { %v1119_v27 = vrot.slane %v1118_v49, 2  ;;  %2040 = vpow2.f32 %v1243_v15  ;;  %v1235_v57 = vmul.f32 1.442695, %v1161_v50  ;;  %v1157_v63 = vsub.f32 %v2684_v37, %v2807_v36 }
 0x22b   : > { %v1099_v9 = vmax.f32 %v1097_v24, %v1098_v7  ;;  %2042 = vpow2.f32 %v1241_v23  ;;  %v1233_v23 = vmul.f32 1.442695, %v1160_v18  ;;  %v1156_v3 = vsub.f32 %v2677_v33, %v2807_v36 }
 0x22c   : > { %v1120_v40 = vmax.f32 %v1118_v49, %v1119_v27  ;;  %v2830_v56 = vpop.f32.mrf.mxu1  ;;  %2044 = vpow2.f32 %v1239_v22  ;;  %v2842_v49 = vld [vmem:[#allocation2 + $0x3] sm:$0x1]  ;;  %v1231_v41 = vmul.f32 1.442695, %v1159_v1  ;;  %v1155_v22 = vsub.f32 %v2670_v29, %v2807_v36 }
 0x22d   : > { %v1100_v61 = vrot.slane %v1099_v9, 1  ;;  %2046 = vpow2.f32 %v1237_v26  ;;  %v1229_v11 = vmul.f32 1.442695, %v1158_v47  ;;  %v1154_v13 = vsub.f32 %v2663_v25, %v2807_v36 }
 0x22e   : > { %v1121_v51 = vrot.slane %v1120_v40, 1  ;;  %2048 = vpow2.f32 %v1235_v57  ;;  %v1227_v26 = vmul.f32 1.442695, %v1157_v63  ;;  %v1225_v29 = vmul.f32 1.442695, %v1156_v3 }
 0x22f   : > { %v2840_v45 = vpop.eup %2038  ;;  %v1101_v27 = vmax.f32 %v1099_v9, %v1100_v61  ;;  %2050 = vpow2.f32 %v1233_v23  ;;  %v1223_v25 = vmul.f32 1.442695, %v1155_v22  ;;  %v1221_v1 = vmul.f32 1.442695, %v1154_v13 }
 0x230   : > { %v2846_v6 = vpop.eup %2040  ;;  %v1122_v37 = vmax.f32 %v1120_v40, %v1121_v51  ;;  %1447 = vmatpush.msrb.mxu0 %v2840_v45  ;;  %2052 = vpow2.f32 %v1231_v41 }
 0x231   : > { %v2851_v33 = vpop.eup %2042  ;;  %v2854_v24 = vmax.f32 %v2836_v0, %v1101_v27  ;;  %2054 = vpow2.f32 %v1229_v11 }
 0x232   : > { %v2857_v15 = vmax.f32 %v2842_v49, %v1122_v37  ;;  %1448 = vmatpush.msrb.mxu0 %v2846_v6  ;;  %v2860_v7 = vpop.eup %2044  ;;  %2056 = vpow2.f32 %v1227_v26 }
 0x233   : > { %v2863_v50 = vperm.slane %v2854_v24, 0  ;;  %1445 = vst [vmem:[#allocation2 + $0x2] sm:$0x1] %v2854_v24  ;;  %v2873_v40 = vpop.eup %2046  ;;  %2058 = vpow2.f32 %v1225_v29  ;;  %v1153_v29 = vsub.f32 %v2656_v21, %v2807_v36 }
 0x234   : > { %v2867_v18 = vperm.slane %v2857_v15, 0  ;;  %1446 = vst [vmem:[#allocation2 + $0x3] sm:$0x1] %v2857_v15  ;;  %1449 = vmatpush.msrb.mxu0 %v2851_v33  ;;  %v2871_v9 = vpop.f32.mrf.mxu1  ;;  %2060 = vpow2.f32 %v1223_v25 }
 0x235   : > { %v1198_v47 = vsub.f32 %v2804_v32, %v2863_v50  ;;  %v1197_v61 = vsub.f32 %v2788_v55, %v2863_v50  ;;  %v1196_v57 = vsub.f32 %v2777_v8, %v2863_v50  ;;  %v2888_v32 = vpop.eup %2048  ;;  %v1195_v8 = vsub.f32 %v2765_v53, %v2863_v50 }
 0x236   : > { %v1214_v63 = vsub.f32 %v2811_v44, %v2867_v18  ;;  %1450 = vmatpush.msrb.mxu0 %v2860_v7  ;;  %v1213_v51 = vsub.f32 %v2791_v62, %v2867_v18  ;;  %v1212_v23 = vsub.f32 %v2780_v14, %v2867_v18  ;;  %v2892_v55 = vpop.eup %2050  ;;  %v1211_v62 = vsub.f32 %v2769_v59, %v2867_v18 }
 0x237   : > { %v1309_v3 = vmul.f32 1.442695, %v1198_v47  ;;  %v1307_v27 = vmul.f32 1.442695, %v1197_v61  ;;  %2062 = vpow2.f32 %v1221_v1  ;;  %v2897_v22 = vpop.eup %2052  ;;  %v1305_v14 = vmul.f32 1.442695, %v1196_v57 }
 0x238   : > { %v1341_v44 = vmul.f32 1.442695, %v1214_v63  ;;  %1451 = vmatpush.msrb.mxu0 %v2873_v40  ;;  %v1339_v41 = vmul.f32 1.442695, %v1213_v51  ;;  %v1194_v37 = vsub.f32 %v2753_v20, %v2863_v50  ;;  %v2901_v11 = vpop.eup %2054  ;;  %v1337_v53 = vmul.f32 1.442695, %v1212_v23 }
 0x239   : > { %2064 = vpow2.f32 %v1309_v3  ;;  %v1210_v13 = vsub.f32 %v2756_v28, %v2867_v18  ;;  %v2906_v26 = vpop.eup %2056  ;;  %v1303_v59 = vmul.f32 1.442695, %v1195_v8  ;;  %v1335_v1 = vmul.f32 1.442695, %v1211_v62 }
 0x23a   : > { %2066 = vpow2.f32 %v1341_v44  ;;  %1452 = vmatpush.msrb.mxu0 %v2888_v32  ;;  %v2910_v25 = vpop.eup %2058  ;;  %v1193_v47 = vsub.f32 %v2742_v10, %v2863_v50  ;;  %v1301_v28 = vmul.f32 1.442695, %v1194_v37  ;;  %v1209_v57 = vsub.f32 %v2745_v12, %v2867_v18 }
 0x23b   : > { %2068 = vpow2.f32 %v1307_v27  ;;  %v2917_v61 = vpop.eup %2060  ;;  %v1333_v21 = vmul.f32 1.442695, %v1210_v13  ;;  %v1152_v51 = vsub.f32 %v2653_v19, %v2807_v36  ;;  %v1219_v10 = vmul.f32 1.442695, %v1153_v29 }
 0x23c   : > { %1453 = vmatpush.msrb.mxu0 %v2892_v55  ;;  %v2913_v20 = vpop.f32.mrf.mxu1  ;;  %2070 = vpow2.f32 %v1339_v41  ;;  %v1192_v3 = vsub.f32 %v2731_v2, %v2863_v50  ;;  %v1299_v12 = vmul.f32 1.442695, %v1193_v47  ;;  %v1208_v8 = vsub.f32 %v2734_v4, %v2867_v18 }
 0x23d   : > { %2072 = vpow2.f32 %v1305_v14  ;;  %v2921_v63 = vpop.eup %2062  ;;  %v1331_v19 = vmul.f32 1.442695, %v1209_v57  ;;  %v1151_v2 = vsub.f32 %v2649_v16, %v2807_v36  ;;  %v1217_v62 = vmul.f32 1.442695, %v1152_v51 }
 0x23e   : > { %1454 = vmatpush.msrb.mxu0 %v2897_v22  ;;  %2074 = vpow2.f32 %v1337_v53  ;;  %v1191_v4 = vsub.f32 %v2719_v58, %v2863_v50  ;;  %v1297_v37 = vmul.f32 1.442695, %v1192_v3  ;;  %v1329_v36 = vmul.f32 1.442695, %v1208_v8 }
 0x23f   : > { %v2926_v23 = vpop.eup %2064  ;;  %2076 = vpow2.f32 %v1303_v59  ;;  %v1207_v13 = vsub.f32 %v2722_v60, %v2867_v18  ;;  %v1190_v58 = vsub.f32 %v2710_v52, %v2863_v50  ;;  %v1215_v29 = vmul.f32 1.442695, %v1151_v2 }
 0x240   : > { %v2930_v27 = vpop.eup %2066  ;;  %1455 = vmatpush.msrb.mxu0 %v2901_v11  ;;  %1493 = vmatpush.msrb.mxu2 %v2926_v23  ;;  %2078 = vpow2.f32 %v1335_v1  ;;  %v1206_v1 = vsub.f32 %v2713_v54, %v2867_v18  ;;  %v1295_v60 = vmul.f32 1.442695, %v1191_v4  ;;  %v1189_v52 = vsub.f32 %v2700_v46, %v2863_v50 }
 0x241   : > { %v2936_v44 = vpop.eup %2068  ;;  %1516 = vmatpush.msrb.mxu3 %v2930_v27  ;;  %2080 = vpow2.f32 %v1301_v28  ;;  %v1327_v57 = vmul.f32 1.442695, %v1207_v13  ;;  %v1205_v54 = vsub.f32 %v2704_v48, %v2867_v18  ;;  %v1293_v51 = vmul.f32 1.442695, %v1190_v58 }
 0x242   : > { %v2941_v41 = vpop.eup %2070  ;;  %1456 = vmatpush.msrb.mxu0 %v2906_v26  ;;  %1494 = vmatpush.msrb.mxu2 %v2936_v44  ;;  %2082 = vpow2.f32 %v1333_v21  ;;  %v1188_v46 = vsub.f32 %v2693_v42, %v2863_v50  ;;  %v1325_v3 = vmul.f32 1.442695, %v1206_v1  ;;  %v1291_v8 = vmul.f32 1.442695, %v1189_v52  ;;  %v446_v52 = vld [vmem:[%s2582_s28] sm:$0xff] }
 0x243   : > { %v2947_v14 = vpop.eup %2072  ;;  %1517 = vmatpush.msrb.mxu3 %v2941_v41  ;;  %2084 = vpow2.f32 %v1219_v10  ;;  %v1186_v13 = vsub.f32 %v2679_v34, %v2863_v50  ;;  %v1185_v34 = vsub.f32 %v2672_v30, %v2863_v50 }
 0x244   : > { %v2950_v53 = vpop.eup %2074  ;;  %1457 = vmatpush.msrb.mxu0 %v2910_v25  ;;  %v2953_v16 = vpop.f32.mrf.mxu1  ;;  %1495 = vmatpush.msrb.mxu2 %v2947_v14  ;;  %2086 = vpow2.f32 %v1299_v12  ;;  %v1204_v12 = vsub.f32 %v2695_v43, %v2867_v18  ;;  %v1203_v43 = vsub.f32 %v2688_v39, %v2867_v18  ;;  %v1202_v39 = vsub.f32 %v2681_v35, %v2867_v18 }
 0x245   : > { %v2960_v59 = vpop.eup %2076  ;;  %1518 = vmatpush.msrb.mxu3 %v2950_v53  ;;  %2088 = vpow2.f32 %v1331_v19  ;;  %v1187_v19 = vsub.f32 %v2686_v38, %v2863_v50  ;;  %v1201_v35 = vsub.f32 %v2674_v31, %v2867_v18 }
 0x246   : > { %v2965_v47 = vpop.eup %2078  ;;  %1458 = vmatpush.msrb.mxu0 %v2917_v61  ;;  %1496 = vmatpush.msrb.mxu2 %v2960_v59  ;;  %2090 = vpow2.f32 %v1217_v62  ;;  %v1323_v62 = vmul.f32 1.442695, %v1205_v54  ;;  %v1317_v30 = vmul.f32 1.442695, %v1202_v39  ;;  %v3268_v39 = vld [vmem:[#allocation34_spill] sm:$0xff] }
 0x247   : > { %v2971_v28 = vpop.eup %2080  ;;  %1519 = vmatpush.msrb.mxu3 %v2965_v47  ;;  %2092 = vpow2.f32 %v1297_v37 }
 0x248   : > { %v2976_v21 = vpop.eup %2082  ;;  %1459 = vmatpush.msrb.mxu0 %v2921_v63  ;;  %1497 = vmatpush.msrb.mxu2 %v2971_v28  ;;  %2094 = vpow2.f32 %v1329_v36  ;;  %v1289_v36 = vmul.f32 1.442695, %v1188_v46 }
 0x249   : > { %v2085_v10 = vpop.eup %2084  ;;  %1520 = vmatpush.msrb.mxu3 %v2976_v21  ;;  %2096 = vpow2.f32 %v1215_v29  ;;  %v1321_v29 = vmul.f32 1.442695, %v1204_v12  ;;  %v1285_v12 = vmul.f32 1.442695, %v1186_v13 }
 0x24a   : > { %v2985_v48 = vpop.eup %2086  ;;  %1460 = vmatpush.msrb.mxu0 %v2085_v10  ;;  %2098 = vpow2.f32 %v1295_v60 }
 0x24b   : > { %v2991_v42 = vpop.eup %2088  ;;  %1498 = vmatpush.msrb.mxu2 %v2985_v48  ;;  %2100 = vpow2.f32 %v1327_v57  ;;  %v1287_v57 = vmul.f32 1.442695, %v1187_v19 }
 0x24c   : > { %v2091_v37 = vpop.eup %2090  ;;  %1521 = vmatpush.msrb.mxu3 %v2991_v42  ;;  %v2999_v38 = vpop.f32.mrf.mxu1  ;;  %2102 = vpow2.f32 %v1293_v51  ;;  %v1319_v51 = vmul.f32 1.442695, %v1203_v43 }
 0x24d   : > { %v3003_v58 = vpop.eup %2092  ;;  %1461 = vmatpush.msrb.mxu0 %v2091_v37  ;;  %2104 = vpow2.f32 %v1325_v3 }
 0x24e   : > { %v3009_v60 = vpop.eup %2094  ;;  %1499 = vmatpush.msrb.mxu2 %v3003_v58  ;;  %2106 = vpow2.f32 %v1291_v8  ;;  %v3265_v8 = vld [vmem:[#allocation35_spill] sm:$0xff] }
 0x24f   : > { %v2097_v54 = vpop.eup %2096  ;;  %1522 = vmatpush.msrb.mxu3 %v3009_v60  ;;  %2108 = vpow2.f32 %v1323_v62  ;;  %v1184_v19 = vsub.f32 %v3265_v8, %v2863_v50  ;;  %v3266_v62 = vld [vmem:[#allocation36_spill] sm:$0xff] }
 0x250   : > { %v3018_v46 = vpop.eup %2098  ;;  %v1351_v3 = vadd.f32 %v2097_v54, %v2091_v37  ;;  %1462 = vmatpush.msrb.mxu0 %v2097_v54  ;;  %2110 = vpow2.f32 %v1289_v36  ;;  %v1200_v43 = vsub.f32 %v3266_v62, %v2867_v18  ;;  %v1283_v37 = vmul.f32 1.442695, %v1185_v34  ;;  %v3267_v36 = vld [vmem:[#allocation33_spill] sm:$0xff] }
 0x251   : > { %v3022_v4 = vpop.eup %2100  ;;  %1463 = vmatmul.f32.vlgmr.msrb.gmra.mxu0 %v446_v52  ;;  %1500 = vmatpush.msrb.mxu2 %v3018_v46  ;;  %2112 = vpow2.f32 %v1321_v29  ;;  %v1183_v13 = vsub.f32 %v3267_v36, %v2863_v50  ;;  %v1315_v29 = vmul.f32 1.442695, %v1201_v35  ;;  %v1199_v52 = vsub.f32 %v3268_v39, %v2867_v18  ;;  %v447_v18 = vld [vmem:[%s2582_s28 + $0x8] sm:$0xff] }
 0x252   : > { %v3027_v31 = vpop.eup %2102  ;;  %v1352_v2 = vadd.f32 %v2085_v10, %v1351_v3  ;;  %1523 = vmatpush.msrb.mxu3 %v3022_v4  ;;  %2114 = vpow2.f32 %v1287_v57  ;;  %v1281_v57 = vmul.f32 1.442695, %v1184_v19 }
 0x253   : > { %v3032_v54 = vpop.eup %2104  ;;  %1501 = vmatpush.msrb.mxu2 %v3027_v31  ;;  %2116 = vpow2.f32 %v1319_v51  ;;  %v1313_v51 = vmul.f32 1.442695, %v1200_v43 }
 0x254   : > { %v3037_v8 = vpop.eup %2106  ;;  %v1353_v10 = vadd.f32 %v2921_v63, %v1352_v2  ;;  %1524 = vmatpush.msrb.mxu3 %v3032_v54  ;;  %2118 = vpow2.f32 %v1285_v12  ;;  %v3044_v50 = vpop.f32.mrf.mxu1  ;;  %v1279_v63 = vmul.f32 1.442695, %v1183_v13  ;;  %v1311_v12 = vmul.f32 1.442695, %v1199_v52 }
 0x255   : > { %v3041_v34 = vpop.eup %2108  ;;  %1502 = vmatpush.msrb.mxu2 %v3037_v8  ;;  %2120 = vpow2.f32 %v1317_v30 }
 0x256   : > { %v2111_v35 = vpop.eup %2110  ;;  %v1354_v3 = vadd.f32 %v2917_v61, %v1353_v10  ;;  %1525 = vmatpush.msrb.mxu3 %v3041_v34  ;;  %2122 = vpow2.f32 %v1283_v37 }
 0x257   : > { %v2113_v2 = vpop.eup %2112  ;;  %1503 = vmatpush.msrb.mxu2 %v2111_v35  ;;  %2124 = vpow2.f32 %v1315_v29 }
 0x258   : > { %v2115_v19 = vpop.eup %2114  ;;  %v1355_v62 = vadd.f32 %v2910_v25, %v1354_v3  ;;  %1526 = vmatpush.msrb.mxu3 %v2113_v2  ;;  %2126 = vpow2.f32 %v1281_v57  ;;  %v452_v3 = vld [vmem:[%s2582_s28 + $0x30] sm:$0xff] }
 0x259   : > { %v2117_v36 = vpop.eup %2116  ;;  %1466 = vmatmul.f32.gmra.mxu0 %v447_v18  ;;  %1504 = vmatpush.msrb.mxu2 %v2115_v19  ;;  %2128 = vpow2.f32 %v1313_v51  ;;  %v450_v51 = vld [vmem:[%s2582_s28 + $0x20] sm:$0xff] }
 0x25a   : > { %v2119_v30 = vpop.eup %2118  ;;  %v1356_v61 = vadd.f32 %v2906_v26, %v1355_v62  ;;  %1527 = vmatpush.msrb.mxu3 %v2117_v36  ;;  %2130 = vpow2.f32 %v1279_v63 }
 0x25b   : > { %v2121_v43 = vpop.eup %2120  ;;  %1505 = vmatpush.msrb.mxu2 %v2119_v30  ;;  %2132 = vpow2.f32 %v1311_v12 }
 0x25c   : > { %v2123_v37 = vpop.eup %2122  ;;  %v1357_v13 = vadd.f32 %v2901_v11, %v1356_v61  ;;  %1528 = vmatpush.msrb.mxu3 %v2121_v43  ;;  %v3052_v29 = vpop.f32.mrf.mxu1 }
 0x25d   : > { %v2125_v25 = vpop.eup %2124  ;;  %1506 = vmatpush.msrb.mxu2 %v2123_v37  ;;  %3269 = vst [vmem:[#allocation35_spill] sm:$0xff] %v3052_v29 }
 0x25e   : > { %v2127_v39 = vpop.eup %2126  ;;  %v1358_v52 = vadd.f32 %v2897_v22, %v1357_v13  ;;  %1529 = vmatpush.msrb.mxu3 %v2125_v25 }
 0x25f   : > { %v2129_v26 = vpop.eup %2128  ;;  %1507 = vmatpush.msrb.mxu2 %v2127_v39 }
 0x260   : > { %v2131_v10 = vpop.eup %2130  ;;  %v1359_v57 = vadd.f32 %v2892_v55, %v1358_v52  ;;  %1530 = vmatpush.msrb.mxu3 %v2129_v26 }
 0x261   : > { %v2133_v18 = vpop.eup %2132  ;;  %v1393_v63 = vadd.f32 %v2131_v10, %v2127_v39  ;;  %1508 = vmatpush.msrb.mxu2 %v2131_v10 }
 0x262   : > { %v1360_v11 = vadd.f32 %v2888_v32, %v1359_v57  ;;  %v1414_v12 = vadd.f32 %v2133_v18, %v2129_v26  ;;  %1531 = vmatpush.msrb.mxu3 %v2133_v18  ;;  %1509 = vmatmul.f32.vlgmr.msrb.gmra.mxu2 %v450_v51  ;;  %v451_v32 = vld [vmem:[%s2582_s28 + $0x28] sm:$0xff]  ;;  %v453_v57 = vld [vmem:[%s2582_s28 + $0x38] sm:$0xff] }
 0x263   : > { %v1394_v22 = vadd.f32 %v2123_v37, %v1393_v63  ;;  %1532 = vmatmul.f32.vlgmr.msrb.gmra.mxu3 %v452_v3  ;;  %v3270_v37 = vsub.f32 %v2795_v5, %v2801_v17 }
 0x264   : > { %v1361_v62 = vadd.f32 %v2873_v40, %v1360_v11  ;;  %v1415_v61 = vadd.f32 %v2125_v25, %v1414_v12  ;;  %v3061_v1 = vpop.f32.mrf.mxu1 }
 0x265   : > { %v1395_v13 = vadd.f32 %v2119_v30, %v1394_v22  ;;  %v1131_v51 = vmul.f32 1.442695, %v3270_v37 }
 0x266   : > { %v1362_v55 = vadd.f32 %v2860_v7, %v1361_v62  ;;  %v1416_v52 = vadd.f32 %v2121_v43, %v1415_v61 }
 0x267   : > { %v1396_v39 = vadd.f32 %v2115_v19, %v1395_v13  ;;  %2134 = vpow2.f32 %v1131_v51 }
 0x268   : > { %v1363_v10 = vadd.f32 %v2851_v33, %v1362_v55  ;;  %v1417_v29 = vadd.f32 %v2117_v36, %v1416_v52 }
 0x269   : > { %v1397_v26 = vadd.f32 %v2111_v35, %v1396_v39  ;;  %v3273_v39 = vld [vmem:[#allocation37_spill] sm:$0xff] }
 0x26a   : > { %v1364_v40 = vadd.f32 %v2846_v6, %v1363_v10  ;;  %v1418_v25 = vadd.f32 %v2113_v2, %v1417_v29  ;;  %1512 = vmatmul.f32.gmra.mxu2 %v451_v32 }
 0x26b   : > { %v1398_v7 = vadd.f32 %v3037_v8, %v1397_v26  ;;  %1535 = vmatmul.f32.gmra.mxu3 %v453_v57  ;;  %v1345_v57 = vld [vmem:[#allocation3 + $0x2] sm:$0x1] }
 0x26c   : > { %v1365_v30 = vadd.f32 %v2840_v45, %v1364_v40  ;;  %v1419_v19 = vadd.f32 %v3041_v34, %v1418_v25  ;;  %v3075_v43 = vpop.f32.mrf.mxu1  ;;  %v1343_v34 = vld [vmem:[#allocation3] sm:$0x1]  ;;  %v1346_v40 = vld [vmem:[#allocation3 + $0x3] sm:$0x1] }
 0x26d   : > { %v1399_v33 = vadd.f32 %v3027_v31, %v1398_v7  ;;  %v3081_v29 = vpop.eup %2134 }
 0x26e   : > { %v1366_v36 = vrot.slane %v1365_v30, 4  ;;  %v1420_v35 = vadd.f32 %v3032_v54, %v1419_v19 }
 0x26f   : > { %v1400_v5 = vadd.f32 %v3018_v46, %v1399_v33 }
 0x270   : > { %v1367_v17 = vadd.f32 %v1366_v36, %v1365_v30  ;;  %v1421_v6 = vadd.f32 %v3022_v4, %v1420_v35  ;;  %v1347_v4 = vmul.f32 %v3081_v29, %v1343_v34 }
 0x271   : > { %v1401_v8 = vadd.f32 %v3003_v58, %v1400_v5 }
 0x272   : > { %v1368_v2 = vrot.slane %v1367_v17, 2  ;;  %v1422_v45 = vadd.f32 %v3009_v60, %v1421_v6 }
 0x273   : > { %v1402_v31 = vadd.f32 %v2985_v48, %v1401_v8 }
 0x274   : > { %v1369_v3 = vadd.f32 %v1368_v2, %v1367_v17  ;;  %v1423_v54 = vadd.f32 %v2991_v42, %v1422_v45  ;;  %v3087_v11 = vpop.f32.mrf.mxu1  ;;  %v3274_v2 = vld [vmem:[#allocation35_spill] sm:$0xff] }
 0x275   : > { %v1403_v18 = vadd.f32 %v2971_v28, %v1402_v31 }
 0x276   : > { %v1370_v63 = vrot.slane %v1369_v3, 1  ;;  %v1424_v46 = vadd.f32 %v2976_v21, %v1423_v54  ;;  %v3271_v21 = vsub.f32 %v2836_v0, %v2854_v24  ;;  %v1060_v0 = vmax.f32 %v3273_v39, %v2830_v56 }
 0x277   : > { %v1404_v58 = vadd.f32 %v2960_v59, %v1403_v18  ;;  %v3272_v59 = vsub.f32 %v2842_v49, %v2857_v15 }
 0x278   : > { %v1371_v60 = vadd.f32 %v1370_v63, %v1369_v3  ;;  %v1425_v12 = vadd.f32 %v2965_v47, %v1424_v46  ;;  %v1135_v61 = vmul.f32 1.442695, %v3271_v21 }
 0x279   : > { %v1405_v48 = vadd.f32 %v2947_v14, %v1404_v58  ;;  %v1137_v47 = vmul.f32 1.442695, %v3272_v59 }
 0x27a   : > { %v1426_v22 = vadd.f32 %v2950_v53, %v1425_v12  ;;  %v1435_v62 = vadd.f32 %v1371_v60, %v1347_v4  ;;  %2136 = vpow2.f32 %v1135_v61 }
 0x27b   : > { %v1406_v42 = vadd.f32 %v2936_v44, %v1405_v48  ;;  %2138 = vpow2.f32 %v1137_v47 }
 0x27c   : > { %v1427_v28 = vadd.f32 %v2941_v41, %v1426_v22  ;;  %1439 = vst [vmem:[#allocation3] sm:$0x1] %v1435_v62  ;;  %v3104_v55 = vpop.f32.mrf.mxu1 }
 0x27d   : > { %v1407_v13 = vadd.f32 %v2926_v23, %v1406_v42  ;;  %v1061_v23 = vmax.f32 %v1060_v0, %v2871_v9 }
 0x27e   : > { %v1428_v14 = vadd.f32 %v2930_v27, %v1427_v28  ;;  %v3124_v28 = vld [vmem:[#allocation2 + $0x1] sm:$0x1] }
 0x27f   : > { %v1408_v53 = vrot.slane %v1407_v13, 4  ;;  %v1062_v37 = vmax.f32 %v1061_v23, %v2913_v20 }
 0x280   : > { %v1429_v52 = vrot.slane %v1428_v14, 4  ;;  %v3109_v49 = vpop.eup %2136 }
 0x281   : > { %v1409_v44 = vadd.f32 %v1408_v53, %v1407_v13  ;;  %v3111_v26 = vpop.eup %2138  ;;  %v1063_v7 = vmax.f32 %v1062_v37, %v2953_v16  ;;  %v1349_v19 = vmul.f32 %v3109_v49, %v1345_v57 }
 0x282   : > { %v1430_v41 = vadd.f32 %v1429_v52, %v1428_v14  ;;  %v1350_v36 = vmul.f32 %v3111_v26, %v1346_v40 }
 0x283   : > { %v1410_v24 = vrot.slane %v1409_v44, 2  ;;  %v1064_v35 = vmax.f32 %v1063_v7, %v2999_v38 }
 0x284   : > { %v1431_v10 = vrot.slane %v1430_v41, 2  ;;  %v733_v27 = vpop.f32.mrf.mxu1 }
 0x285   : > { %v1411_v32 = vadd.f32 %v1410_v24, %v1409_v44  ;;  %v1065_v6 = vmax.f32 %v1064_v35, %v3044_v50 }
 0x286   : > { %v1432_v15 = vadd.f32 %v1431_v10, %v1430_v41 }
 0x287   : > { %v1412_v51 = vrot.slane %v1411_v32, 1  ;;  %v1066_v45 = vmax.f32 %v1065_v6, %v3274_v2 }
 0x288   : > { %v1433_v25 = vrot.slane %v1432_v15, 1 }
 0x289   : > { %v1413_v30 = vadd.f32 %v1412_v51, %v1411_v32  ;;  %v1067_v31 = vmax.f32 %v1066_v45, %v3061_v1 }
 0x28a   : > { %v1434_v33 = vadd.f32 %v1433_v25, %v1432_v15 }
 0x28b   : > { %v1437_v5 = vadd.f32 %v1413_v30, %v1349_v19  ;;  %v1068_v34 = vmax.f32 %v1067_v31, %v3075_v43 }
 0x28c   : > { %v1438_v17 = vadd.f32 %v1434_v33, %v1350_v36  ;;  %v736_v8 = vpop.f32.mrf.mxu1 }
 0x28d   : > { %1441 = vst [vmem:[#allocation3 + $0x2] sm:$0x1] %v1437_v5  ;;  %v1069_v3 = vmax.f32 %v1068_v34, %v3087_v11  ;;  %v1539_v34 = vld [vmem:[#allocation4 + $0x30] sm:$0xff] }
 0x28e   : > { %1442 = vst [vmem:[#allocation3 + $0x3] sm:$0x1] %v1438_v17 }
 0x28f   : > { %v1070_v18 = vmax.f32 %v1069_v3, %v3104_v55 }
 0x291   : > { %v1071_v63 = vmax.f32 %v1070_v18, %v733_v27 }
 0x293   : > { %v1072_v46 = vmax.f32 %v1071_v63, %v736_v8 }
 0x294   : > { %v739_v54 = vpop.f32.mrf.mxu1 }
 0x295   : > { %v1073_v4 = vmax.f32 %v1072_v46, %v739_v54 }
 0x29c   : > { %v742_v58 = vpop.f32.mrf.mxu1 }
 0x29d   : > { %v1074_v60 = vmax.f32 %v1073_v4, %v742_v58 }
 0x29f   : > { %v1075_v12 = vrot.slane %v1074_v60, 4 }
 0x2a1   : > { %v1076_v48 = vmax.f32 %v1074_v60, %v1075_v12 }
 0x2a3   : > { %v1077_v22 = vrot.slane %v1076_v48, 2 }
 0x2a5   : > { %v1078_v62 = vmax.f32 %v1076_v48, %v1077_v22 }
 0x2a7   : > { %v1079_v42 = vrot.slane %v1078_v62, 1 }
 0x2a9   : > { %v1080_v21 = vmax.f32 %v1078_v62, %v1079_v42  ;;  %v1540_v42 = vld [vmem:[#allocation4] sm:$0xff] }
 0x2ab   : > { %v3127_v61 = vmax.f32 %v3124_v28, %v1080_v21 }
 0x2ad   : > { %v1144_v13 = vperm.slane %v3127_v61, 0  ;;  %1444 = vst [vmem:[#allocation2 + $0x1] sm:$0x1] %v3127_v61 }
 0x2af   : > { %v1182_v59 = vsub.f32 %v742_v58, %v1144_v13  ;;  %v1181_v47 = vsub.f32 %v739_v54, %v1144_v13  ;;  %v1180_v14 = vsub.f32 %v736_v8, %v1144_v13  ;;  %v1179_v44 = vsub.f32 %v733_v27, %v1144_v13 }
 0x2b0   : > { %v1178_v0 = vsub.f32 %v3104_v55, %v1144_v13  ;;  %v1177_v10 = vsub.f32 %v3087_v11, %v1144_v13  ;;  %v1176_v32 = vsub.f32 %v3075_v43, %v1144_v13  ;;  %v1175_v15 = vsub.f32 %v3061_v1, %v1144_v13 }
 0x2b1   : > { %v1277_v53 = vmul.f32 1.442695, %v1182_v59  ;;  %v1275_v52 = vmul.f32 1.442695, %v1181_v47  ;;  %v1273_v41 = vmul.f32 1.442695, %v1180_v14  ;;  %v1168_v27 = vsub.f32 %v2830_v56, %v1144_v13 }
 0x2b2   : > { %v1271_v24 = vmul.f32 1.442695, %v1179_v44  ;;  %v1269_v23 = vmul.f32 1.442695, %v1178_v0  ;;  %v1267_v37 = vmul.f32 1.442695, %v1177_v10  ;;  %v1167_v55 = vsub.f32 %v3273_v39, %v1144_v13 }
 0x2b3   : > { %2140 = vpow2.f32 %v1277_v53  ;;  %v1265_v11 = vmul.f32 1.442695, %v1176_v32  ;;  %v1174_v40 = vsub.f32 %v3274_v2, %v1144_v13  ;;  %v1263_v43 = vmul.f32 1.442695, %v1175_v15  ;;  %v449_v10 = vld [vmem:[%s2582_s28 + $0x18] sm:$0xff]  ;;  %v1543_v15 = vld [vmem:[#allocation4 + $0x8] sm:$0xff] }
 0x2b4   : > { %2142 = vpow2.f32 %v1275_v52  ;;  %v1169_v1 = vsub.f32 %v2871_v9, %v1144_v13  ;;  %v1173_v56 = vsub.f32 %v3044_v50, %v1144_v13  ;;  %v1249_v7 = vmul.f32 1.442695, %v1168_v27  ;;  %v448_v52 = vld [vmem:[%s2582_s28 + $0x10] sm:$0xff]  ;;  %v1545_v27 = vld [vmem:[#allocation4 + $0x28] sm:$0xff] }
 0x2b5   : > { %2144 = vpow2.f32 %v1273_v41  ;;  %v1170_v39 = vsub.f32 %v2913_v20, %v1144_v13  ;;  %v1247_v30 = vmul.f32 1.442695, %v1167_v55  ;;  %v1261_v33 = vmul.f32 1.442695, %v1174_v40 }
 0x2b6   : > { %2146 = vpow2.f32 %v1271_v24  ;;  %v1172_v36 = vsub.f32 %v2999_v38, %v1144_v13  ;;  %v1171_v9 = vsub.f32 %v2953_v16, %v1144_v13  ;;  %v1251_v35 = vmul.f32 1.442695, %v1169_v1 }
 0x2b7   : > { %2148 = vpow2.f32 %v1269_v23  ;;  %v1259_v50 = vmul.f32 1.442695, %v1173_v56  ;;  %v1253_v17 = vmul.f32 1.442695, %v1170_v39  ;;  %v1551_v16 = vperm.slane %v3081_v29, 0 }
 0x2b8   : > { %2150 = vpow2.f32 %v1267_v37  ;;  %v1257_v6 = vmul.f32 1.442695, %v1172_v36  ;;  %v1255_v8 = vmul.f32 1.442695, %v1171_v9  ;;  %v1553_v23 = vperm.slane %v3109_v49, 0  ;;  %v1546_v36 = vld [vmem:[#allocation4 + $0x38] sm:$0xff] }
 0x2b9   : > { %v3135_v57 = vpop.eup %2140  ;;  %2152 = vpow2.f32 %v1265_v11  ;;  %v1559_v46 = vmul.f32 %v1551_v16, %v1539_v34  ;;  %v1560_v13 = vmul.f32 %v1551_v16, %v1540_v42  ;;  %v1554_v37 = vperm.slane %v3111_v26, 0  ;;  %v1541_v16 = vld [vmem:[#allocation4 + $0x18] sm:$0xff] }
 0x2ba   : > { %1470 = vmatpush.msrb.mxu1 %v3135_v57  ;;  %v3140_v51 = vpop.eup %2142  ;;  %2154 = vpow2.f32 %v1263_v43  ;;  %v1128_v55 = vsub.f32 %v3124_v28, %v3127_v61  ;;  %v1563_v40 = vmul.f32 %v1553_v23, %v1543_v15 }
 0x2bb   : > { %v3145_v25 = vpop.eup %2144  ;;  %2156 = vpow2.f32 %v1249_v7  ;;  %v1565_v56 = vmul.f32 %v1554_v37, %v1545_v27 }
 0x2bc   : > { %1471 = vmatpush.msrb.mxu1 %v3140_v51  ;;  %v3150_v19 = vpop.eup %2146  ;;  %2158 = vpow2.f32 %v1247_v30  ;;  %v1133_v49 = vmul.f32 1.442695, %v1128_v55 }
 0x2bd   : > { %v2149_v5 = vpop.eup %2148  ;;  %2160 = vpow2.f32 %v1261_v33  ;;  %v1544_v33 = vld [vmem:[#allocation4 + $0x20] sm:$0xff] }
 0x2be   : > { %1472 = vmatpush.msrb.mxu1 %v3145_v25  ;;  %v2151_v20 = vpop.eup %2150  ;;  %2162 = vpow2.f32 %v1251_v35  ;;  %v1564_v61 = vmul.f32 %v1553_v23, %v1544_v33  ;;  %v1566_v35 = vmul.f32 %v1554_v37, %v1546_v36 }
 0x2bf   : > { %v2153_v2 = vpop.eup %2152  ;;  %2164 = vpow2.f32 %v1259_v50 }
 0x2c0   : > { %1473 = vmatpush.msrb.mxu1 %v3150_v19  ;;  %v2155_v38 = vpop.eup %2154  ;;  %2166 = vpow2.f32 %v1253_v17 }
 0x2c1   : > { %v2157_v45 = vpop.eup %2156  ;;  %2168 = vpow2.f32 %v1257_v6  ;;  %v1344_v6 = vld [vmem:[#allocation3 + $0x1] sm:$0x1] }
 0x2c2   : > { %1474 = vmatpush.msrb.mxu1 %v2149_v5  ;;  %v2159_v31 = vpop.eup %2158  ;;  %2170 = vpow2.f32 %v1255_v8 }
 0x2c3   : > { %v2161_v3 = vpop.eup %2160  ;;  %v1372_v54 = vadd.f32 %v2159_v31, %v2157_v45  ;;  %2172 = vpow2.f32 %v1133_v49 }
 0x2c4   : > { %1475 = vmatpush.msrb.mxu1 %v2151_v20  ;;  %v2163_v18 = vpop.eup %2162 }
 0x2c5   : > { %v2165_v63 = vpop.eup %2164  ;;  %v1373_v4 = vadd.f32 %v2163_v18, %v1372_v54  ;;  %v1542_v54 = vld [vmem:[#allocation4 + $0x10] sm:$0xff] }
 0x2c6   : > { %1476 = vmatpush.msrb.mxu1 %v2153_v2  ;;  %v2167_v58 = vpop.eup %2166 }
 0x2c7   : > { %v2169_v12 = vpop.eup %2168  ;;  %v1374_v22 = vadd.f32 %v2167_v58, %v1373_v4 }
 0x2c8   : > { %1477 = vmatpush.msrb.mxu1 %v2155_v38  ;;  %v2171_v29 = vpop.eup %2170 }
 0x2c9   : > { %v1375_v62 = vadd.f32 %v2171_v29, %v1374_v22 }
 0x2ca   : > { %1478 = vmatpush.msrb.mxu1 %v2161_v3 }
 0x2cb   : > { %v1376_v21 = vadd.f32 %v2169_v12, %v1375_v62 }
 0x2cc   : > { %1479 = vmatpush.msrb.mxu1 %v2165_v63 }
 0x2cd   : > { %v1377_v59 = vadd.f32 %v2165_v63, %v1376_v21 }
 0x2ce   : > { %v1464_v60 = vpop.f32.mrf.mxu0  ;;  %1480 = vmatpush.msrb.mxu1 %v2169_v12 }
 0x2cf   : > { %v1567_v48 = vadd.f32 %v1559_v46, %v1464_v60  ;;  %v1378_v53 = vadd.f32 %v2161_v3, %v1377_v59 }
 0x2d0   : > { %1481 = vmatpush.msrb.mxu1 %v2171_v29 }
 0x2d1   : > { %1575 = vst [vmem:[#allocation4 + $0x30] sm:$0xff] %v1567_v48  ;;  %v1379_v44 = vadd.f32 %v2155_v38, %v1378_v53 }
 0x2d2   : > { %1482 = vmatpush.msrb.mxu1 %v2167_v58 }
 0x2d3   : > { %v1380_v41 = vadd.f32 %v2153_v2, %v1379_v44 }
 0x2d4   : > { %1483 = vmatpush.msrb.mxu1 %v2163_v18 }
 0x2d5   : > { %v1381_v0 = vadd.f32 %v2151_v20, %v1380_v41  ;;  %v2173_v20 = vpop.eup %2172 }
 0x2d6   : > { %v1467_v47 = vpop.f32.mrf.mxu0  ;;  %1484 = vmatpush.msrb.mxu1 %v2157_v45  ;;  %v1348_v2 = vmul.f32 %v2173_v20, %v1344_v6  ;;  %v1552_v45 = vperm.slane %v2173_v20, 0 }
 0x2d7   : > { %v1568_v14 = vadd.f32 %v1560_v13, %v1467_v47  ;;  %v1382_v24 = vadd.f32 %v2149_v5, %v1381_v0 }
 0x2d8   : > { %1485 = vmatpush.msrb.mxu1 %v2159_v31  ;;  %v1561_v31 = vmul.f32 %v1552_v45, %v1541_v16  ;;  %v1562_v18 = vmul.f32 %v1552_v45, %v1542_v54 }
 0x2d9   : > { %1576 = vst [vmem:[#allocation4] sm:$0xff] %v1568_v14  ;;  %1486 = vmatmul.f32.vlgmr.msrb.gmra.mxu1 %v448_v52  ;;  %v1383_v32 = vadd.f32 %v3150_v19, %v1382_v24 }
 0x2db   : > { %v1384_v11 = vadd.f32 %v3145_v25, %v1383_v32 }
 0x2dd   : > { %v1385_v43 = vadd.f32 %v3140_v51, %v1384_v11 }
 0x2df   : > { %v1386_v30 = vadd.f32 %v3135_v57, %v1385_v43 }
 0x2e1   : > { %1489 = vmatmul.f32.gmra.mxu1 %v449_v10  ;;  %v1387_v26 = vrot.slane %v1386_v30, 4 }
 0x2e3   : > { %v1388_v28 = vadd.f32 %v1387_v26, %v1386_v30 }
 0x2e5   : > { %v1510_v1 = vpop.f32.mrf.mxu2  ;;  %v1389_v25 = vrot.slane %v1388_v28, 2 }
 0x2e6   : > { %v1571_v7 = vadd.f32 %v1563_v40, %v1510_v1  ;;  %v1533_v39 = vpop.f32.mrf.mxu3 }
 0x2e7   : > { %v1573_v19 = vadd.f32 %v1565_v56, %v1533_v39  ;;  %v1390_v50 = vadd.f32 %v1389_v25, %v1388_v28 }
 0x2e8   : > { %1579 = vst [vmem:[#allocation4 + $0x8] sm:$0xff] %v1571_v7 }
 0x2e9   : > { %1581 = vst [vmem:[#allocation4 + $0x28] sm:$0xff] %v1573_v19  ;;  %v1391_v57 = vrot.slane %v1390_v50, 1 }
 0x2eb   : > { %v1392_v8 = vadd.f32 %v1391_v57, %v1390_v50 }
 0x2ed   : > { %v1513_v9 = vpop.f32.mrf.mxu2  ;;  %v1436_v38 = vadd.f32 %v1392_v8, %v1348_v2 }
 0x2ee   : > { %v1572_v51 = vadd.f32 %v1564_v61, %v1513_v9  ;;  %v1536_v5 = vpop.f32.mrf.mxu3 }
 0x2ef   : > { %v1574_v17 = vadd.f32 %v1566_v35, %v1536_v5  ;;  %1440 = vst [vmem:[#allocation3 + $0x1] sm:$0x1] %v1436_v38 }
 0x2f0   : > { %1580 = vst [vmem:[#allocation4 + $0x20] sm:$0xff] %v1572_v51 }
 0x2f1   : > { %1582 = vst [vmem:[#allocation4 + $0x38] sm:$0xff] %v1574_v17 }
 0x356   : > { %v1487_v34 = vpop.f32.mrf.mxu1 }
 0x357   : > { %v1569_v3 = vadd.f32 %v1561_v31, %v1487_v34 }
 0x359   : > { %1577 = vst [vmem:[#allocation4 + $0x18] sm:$0xff] %v1569_v3 }
 0x35d   : > { %1586 = sbr.rel (%p1887_p9) target bundleno = 892 (0x37c), region = 52 }
 0x35e   : > { %v1490_v63 = vpop.f32.mrf.mxu1 }
 0x35f   : > { %v1570_v46 = vadd.f32 %v1562_v18, %v1490_v63 }
 0x361   : > { %1578 = vst [vmem:[#allocation4 + $0x10] sm:$0xff] %v1570_v46 }
 0x362   : > { %v1587_v4 = vld [vmem:[#allocation3] sm:$0x1]  ;;  %v1588_v58 = vld [vmem:[#allocation3 + $0x1] sm:$0x1]  ;;  %v1589_v60 = vld [vmem:[#allocation3 + $0x2] sm:$0x1] }
 0x363   : > { %2174 = vrcp.f32 %v1587_v4  ;;  %v1590_v12 = vld [vmem:[#allocation3 + $0x3] sm:$0x1]  ;;  %v1607_v44 = vld [vmem:[#allocation4 + $0x30] sm:$0xff]  ;;  %v1608_v41 = vld [vmem:[#allocation4] sm:$0xff] }
 0x364   : > { %2176 = vrcp.f32 %v1588_v58  ;;  %v1609_v23 = vld [vmem:[#allocation4 + $0x18] sm:$0xff]  ;;  %v1611_v27 = vld [vmem:[#allocation4 + $0x8] sm:$0xff]  ;;  %v1612_v1 = vld [vmem:[#allocation4 + $0x20] sm:$0xff] }
 0x365   : > { %2178 = vrcp.f32 %v1589_v60  ;;  %v1613_v39 = vld [vmem:[#allocation4 + $0x28] sm:$0xff]  ;;  %v1614_v19 = vld [vmem:[#allocation4 + $0x38] sm:$0xff] }
 0x366   : > { %2180 = vrcp.f32 %v1590_v12 }
 0x368   : > { %v1610_v32 = vld [vmem:[#allocation4 + $0x10] sm:$0xff] }
 0x369   : > { %v2175_v48 = vpop.eup %2174 }
 0x36a   : > { %v2177_v22 = vpop.eup %2176  ;;  %v1595_v29 = vmul.f32 %v2175_v48, %v1587_v4 }
 0x36b   : > { %v2179_v62 = vpop.eup %2178  ;;  %v1596_v42 = vmul.f32 %v2177_v22, %v1588_v58 }
 0x36c   : > { %v2181_v21 = vpop.eup %2180  ;;  %v1599_v13 = vsub.f32 2.0, %v1595_v29  ;;  %v1597_v59 = vmul.f32 %v2179_v62, %v1589_v60 }
 0x36d   : > { %v1600_v47 = vsub.f32 2.0, %v1596_v42  ;;  %v1598_v14 = vmul.f32 %v2181_v21, %v1590_v12 }
 0x36e   : > { %v1603_v53 = vmul.f32 %v2175_v48, %v1599_v13  ;;  %v1601_v52 = vsub.f32 2.0, %v1597_v59 }
 0x36f   : > { %v1604_v0 = vmul.f32 %v2177_v22, %v1600_v47  ;;  %v1602_v24 = vsub.f32 2.0, %v1598_v14 }
 0x370   : > { %v1619_v10 = vperm.slane %v1603_v53, 0  ;;  %v1605_v15 = vmul.f32 %v2179_v62, %v1601_v52 }
 0x371   : > { %v1620_v37 = vperm.slane %v1604_v0, 0  ;;  %v1606_v55 = vmul.f32 %v2181_v21, %v1602_v24 }
 0x372   : > { %v1627_v11 = vmul.f32 %v1619_v10, %v1607_v44  ;;  %v1628_v40 = vmul.f32 %v1619_v10, %v1608_v41  ;;  %v1621_v43 = vperm.slane %v1605_v15, 0 }
 0x373   : > { %v1629_v56 = vmul.f32 %v1620_v37, %v1609_v23  ;;  %v1630_v7 = vmul.f32 %v1620_v37, %v1610_v32  ;;  %v1622_v49 = vperm.slane %v1606_v55, 0 }
 0x374   : > { %1635 = vst [vmem:[%s2584_s11] sm:$0xff] %v1627_v11  ;;  %v1631_v30 = vmul.f32 %v1621_v43, %v1611_v27  ;;  %v1632_v26 = vmul.f32 %v1621_v43, %v1612_v1 }
 0x375   : > { %1636 = vst [vmem:[%s2584_s11 + $0x8] sm:$0xff] %v1628_v40  ;;  %v1633_v33 = vmul.f32 %v1622_v49, %v1613_v39  ;;  %v1634_v36 = vmul.f32 %v1622_v49, %v1614_v19 }
 0x376   : > { %1637 = vst [vmem:[%s2584_s11 + $0x10] sm:$0xff] %v1629_v56 }
 0x377   : > { %1638 = vst [vmem:[%s2584_s11 + $0x18] sm:$0xff] %v1630_v7 }
 0x378   : > { %1639 = vst [vmem:[%s2584_s11 + $0x20] sm:$0xff] %v1631_v30 }
 0x379   : > { %1640 = vst [vmem:[%s2584_s11 + $0x28] sm:$0xff] %v1632_v26 }
 0x37a   : > { %1641 = vst [vmem:[%s2584_s11 + $0x30] sm:$0xff] %v1633_v33 }
 0x37b   : > { %1642 = vst [vmem:[%s2584_s11 + $0x38] sm:$0xff] %v1634_v36 }
 0x37c PF: > { %s1889_s18 = sshll.u32 %s2296_s19, 3  ;;  %s1658_s21 = sshll.u32 %s2584_s11, 4  ;;  %s1659_s21 = int_to_ptr.vmem [resolvable:$true] %s1658_s21 }
 0x37d   : > { %s1657_s9 = scalar_lea.hbm %s3231_s3, %s1889_s18  ;;  %s1644_s27 = scalar_lea.sflag [#allocation8], %s2564_s30 }
 0x37e   : > { %s1660_s29 = sshll.u32 %s1657_s9, 4  ;;  %s2202_s19 = scalar_lea.hbm %s3231_s3, 128  ;;  %s1661_s29 = int_to_ptr.hbm [resolvable:$true] %s1660_s29 }
 0x37f   : > { %s2196_s17 = sshra.s32 %s1661_s29, 4  ;;  %s2197_s17 = int_to_ptr.hbm [resolvable:$true] %s2196_s17 }
 0x380   : > { %s2198_s26 = scalar_lea.hbm %s2197_s17, 64  ;;  %p2203_p0 = scmp.lt.s32.totalorder %s2197_s17, %s3231_s3 }
 0x381   : > { %p2199_p11 = scmp.ne.s32.totalorder %s2197_s17, %s2198_s26  ;;  %p2204_p5 = scmp.lt.s32.totalorder %s2202_s19, %s2198_s26 }
 0x383   : > { %p2200_p12 = pnand %p2199_p11, %p2475_p4  ;;  %p2205_p8 = por %p2204_p5, %p2203_p0 }
 0x385   : > { %p2201_p13 = pneg %p2200_p12 }
 0x387   : > { %p2206_p2 = pnand %p2205_p8, %p2201_p13 }
 0x389   : > { %2209 = shalt.err (!%p2206_p2)
}
 0x38a   : > { %s2330_s30 = smov 128   ;;  %s2331_s24 = smov 256  }
 0x38b   : > { %s2332_s15 = smov 8  }
 0x38c   : > { %1919 = dma.vmem_to_hbm [thread:$0]  (%p2475_p4), %s1659_s21, 1024, %s1661_s29, %s1644_s27, %s2330_s30, %s2331_s24, %s2332_s15  }
 0x38d PF: > { %s3275_s25 = sld [smem:[#allocation25_spill]]  ;;  %p1925_p1 = scmp.ge.s32.totalorder %s2308_s22, 2 }
 0x38f   : > { %p1922_p3 = pnand %p1925_p1, %p2482_p10 }
 0x391   : > { %p1923_p6 = pneg %p1922_p3 }
 0x393   : > { %s1675_s28 = sand.u32 1, %s3275_s25  }
 0x394   : > { %s1676_s11 = scalar_lea.sflag [#allocation8], %s1675_s28 }
 0x395   : > { %2263 = dma.done.wait (%p1923_p6), %s1676_s11, 1024  }
 0x396   : > { %2265 = vsyncadd (%p1923_p6), %s1676_s11, 4294966272  ;;  %s22_s22 = sadd.s32 1, %s2308_s22   ;;  %s3277_s18 = sld [smem:[#allocation30_spill]] }
 0x397   : > { %p19_p7 = scmp.ge.s32.totalorder %s22_s22, 6   ;;  %s3278_s10 = sld [smem:[#allocation26_spill]] }
 0x398   : > { %s3279_s17 = sld [smem:[#allocation31_spill]]  ;;  %s3283_s12 = smov %s2272_s13 }
 0x399   : > { %s3280_s19 = sld [smem:[#allocation27_spill]]  ;;  %s3284_s13 = smov %s2276_s14 }
 0x39a   : > { %s3281_s23 = sld [smem:[#allocation28_spill]]  ;;  %s3286_s15 = smov %s2284_s16 }
 0x39b   : > { %s3282_s21 = sld [smem:[#allocation29_spill]] }
 0x39c   : > { %s3285_s14 = smov %s3277_s18  ;;  %s3288_s18 = smov %s2300_s20 }
 0x39d   : > { %s3287_s16 = smov %s3278_s10  ;;  %21 = sbr.rel (!%p19_p7) target bundleno = 11 (0xb), region = 124 }
 0x3a0   : > { %s3289_s20 = smov %s3281_s23 }
 0x3a2   :  { %1682 = vsyncpa [#allocation7], 1 }
 0x3a3   :  { %1684 = vsyncpa [#allocation7 + $0x1], 1 }
 0x3a4   :  { %1685 = vsyncpa [#allocation10], 1 }
 0x3a5   :  { %1687 = vsyncpa [#allocation10 + $0x1], 1 }
 0x3a6   :  { %1688 = vsyncpa [#allocation8], 1 }
 0x3a7   :  { %1690 = vsyncpa [#allocation8 + $0x1], 1 }

</bundles_post_ra>
